<compile_context>
chip_gen: v6e
topology: v6e:2x2x1
jax: 0.10.0
libtpu: 0.0.40
codegen_flags: <defaults>
</compile_context>

<pallas_src>
import functools

import jax
import jax.numpy as jnp
from jax.experimental import pallas as pl
from jax.experimental.pallas import tpu as pltpu


def _round_up(x, m):
    return ((x + m - 1) // m) * m


def _pad2(a, rows, cols):
    return jnp.pad(a, ((0, rows - a.shape[0]), (0, cols - a.shape[1])))


def _gru_kernel(acts_ref, h0_ref, whrz_ref, whh_ref, hs_ref, h_scratch,
                *, t_chunk, hp):
    """One grid step = one (batch_block, time_chunk) tile of the recurrence.

    acts_ref : (t_chunk, Bb, 3*Hp)  precomputed [x_4r | x_4z | x_4h] (compute dtype)
    h0_ref   : (Bb, Hp)             initial hidden for this batch block
    whrz_ref : (Hp, 2*Hp)           W_h_rz^T, r/z halves each padded to Hp
    whh_ref  : (Hp, Hp)             W_hh^T
    hs_ref   : (t_chunk, Bb, Hp)    output hiddens tile
    h_scratch: (Bb, Hp) f32         hidden state carried across time chunks
    """
    t = pl.program_id(1)

    @pl.when(t == 0)
    def _():
        h_scratch[...] = h0_ref[...].astype(jnp.float32)

    # Weight loads hoisted above the time loop (keep them here).
    w_rz = whrz_ref[...]          # compute dtype (f32 or bf16)
    w_hh = whh_ref[...]
    cdt = w_rz.dtype

    def step(i, carry):
        # h is re-read from VMEM scratch each iteration so its vreg live range
        # is bounded to a single step (avoids spills when Bb*Hp is large).
        h = h_scratch[...]                               # (Bb, Hp) f32
        a = acts_ref[i]                                  # (Bb, 3*Hp), compute dtype

        rz = jax.nn.sigmoid(
            jnp.dot(h.astype(cdt), w_rz, preferred_element_type=jnp.float32)
            + a[:, : 2 * hp])
        r = rz[:, :hp]
        z = rz[:, hp:]

        gh = jnp.tanh(
            jnp.dot((r * h).astype(cdt), w_hh, preferred_element_type=jnp.float32)
            + a[:, 2 * hp:])

        h = h + z * (gh - h)                             # == (1-z)*h + z*gh
        h_scratch[...] = h
        hs_ref[i] = h.astype(hs_ref.dtype)
        return carry

    jax.lax.fori_loop(0, t_chunk, step, 0, unroll=True)


def gru_forward(X, h0, params, *, t_chunk=16, compute_dtype=None,
                out_dtype=None, batch_block=None):
    """X: (T, B, D), h0: (B, H). Returns (hiddens (T,B,H), last_hidden (B,H)).

    compute_dtype: dtype for matmul operands AND the stored activations /
      weights inside the kernel (e.g. jnp.bfloat16 for 2x MXU throughput and
      half the acts/weight HBM + VMEM traffic); accumulation and gate math
      stay f32.  None -> X.dtype (exact f32 semantics).
    out_dtype: dtype of the hiddens writeback (e.g. jnp.bfloat16 to halve the
      second-largest HBM stream).  None -> X.dtype.
    batch_block: rows of the padded batch per grid block.  None -> one block
      (right choice on single-TC v5e/v6e: fills the MXU M dimension as much as
      the real batch allows).  On v7x (2 TensorCores) pass ~ceil(Bp/2) so the
      "parallel" batch axis has one block per core.
    """
    T, B, D = X.shape
    H = h0.shape[1]
    cdt = jnp.dtype(compute_dtype) if compute_dtype is not None else jnp.dtype(X.dtype)
    odt = jnp.dtype(out_dtype) if out_dtype is not None else jnp.dtype(X.dtype)

    # Lane/sublane alignment.
    Hp = _round_up(H, 128)
    Bp = _round_up(B, 8)
    Bb = Bp if batch_block is None else _round_up(min(batch_block, Bp), 8)
    Bp = _round_up(Bp, Bb)
    n_b = Bp // Bb

    # Time chunking.  If Tc does not divide T, the trailing padded steps run
    # on bias-only activations and are sliced off (correct, mildly wasteful).
    Tc = max(1, min(t_chunk, T))
    Tp = _round_up(T, Tc)
    n_t = Tp // Tc

    # ------------------------------------------------------------------
    # Hoisted input projections: one big (Tp*Bp, D) x (D, 3*Hp) matmul.
    # Column layout of the result: [r (Hp) | z (Hp) | candidate (Hp)].
    # Stored in the compute dtype (bf16 on the bf16 path) -> halves the
    # dominant HBM stream into the recurrence kernel.
    # ------------------------------------------------------------------
    Wx_rz_T = params["W_x_rz"].T                      # (D, 2H)
    W_cat = jnp.concatenate([
        _pad2(Wx_rz_T[:, :H], D, Hp),                 # r columns
        _pad2(Wx_rz_T[:, H:], D, Hp),                 # z columns
        _pad2(params["W_xh"].T, D, Hp),               # candidate columns
    ], axis=1)                                        # (D, 3*Hp)
    b_cat = jnp.concatenate([
        jnp.pad(params["b_rz"][:H], (0, Hp - H)),
        jnp.pad(params["b_rz"][H:], (0, Hp - H)),
        jnp.pad(params["b_h"], (0, Hp - H)),
    ])                                                # (3*Hp,)

    Xp = jnp.pad(X, ((0, Tp - T), (0, Bp - B), (0, 0)))
    acts = (jnp.dot(Xp.reshape(Tp * Bp, D).astype(cdt), W_cat.astype(cdt),
                    preferred_element_type=jnp.float32) + b_cat)
    acts = acts.reshape(Tp, Bp, 3 * Hp).astype(cdt)

    # ------------------------------------------------------------------
    # Recurrent weights: transpose, split r/z, pad each half to Hp columns
    # (so r/z slices inside the kernel are lane-aligned), cast to compute
    # dtype.  Padded rows/columns are zero (see padding invariants above).
    # ------------------------------------------------------------------
    Wh_rz_T = params["W_h_rz"].T                      # (H, 2H)
    whrz_p = jnp.concatenate([
        _pad2(Wh_rz_T[:, :H], Hp, Hp),
        _pad2(Wh_rz_T[:, H:], Hp, Hp),
    ], axis=1).astype(cdt)                            # (Hp, 2*Hp)
    whh_p = _pad2(params["W_hh"].T, Hp, Hp).astype(cdt)   # (Hp, Hp)

    h0_p = _pad2(h0, Bp, Hp)                          # (Bp, Hp)

    grid_spec = pltpu.PrefetchScalarGridSpec(
        num_scalar_prefetch=0,
        grid=(n_b, n_t),                              # batch parallel, time serial
        in_specs=[
            pl.BlockSpec((Tc, Bb, 3 * Hp), lambda b, t: (t, b, 0)),   # acts
            pl.BlockSpec((Bb, Hp), lambda b, t: (b, 0)),              # h0
            pl.BlockSpec((Hp, 2 * Hp), lambda b, t: (0, 0)),          # W_h_rz^T
            pl.BlockSpec((Hp, Hp), lambda b, t: (0, 0)),              # W_hh^T
        ],
        out_specs=pl.BlockSpec((Tc, Bb, Hp), lambda b, t: (t, b, 0)), # hiddens
        scratch_shapes=[pltpu.VMEM((Bb, Hp), jnp.float32)],
    )

    # Generation-aware VMEM limit: ~112 MiB on 128 MiB chips (v5e/v6e),
    # ~56 MiB on 64 MiB chips (v7x) -- always leave headroom below physical.
    try:
        vmem_cap = int(pltpu.get_tpu_info().vmem_capacity_bytes)
    except Exception:
        vmem_cap = 64 * 1024 * 1024
    headroom = (8 << 20) if vmem_cap <= (64 << 20) else (16 << 20)
    vmem_limit = int(max(min(vmem_cap - headroom, 112 << 20), 16 << 20))

    itemsize = lambda d: jnp.dtype(d).itemsize
    cost = pl.CostEstimate(
        flops=int(Tp * Bp * (2 * Hp * 2 * Hp + 2 * Hp * Hp)),
        transcendentals=int(Tp * Bp * 3 * Hp),
        bytes_accessed=int(acts.size * itemsize(cdt)
                           + Tp * Bp * Hp * itemsize(odt)
                           + (whrz_p.size + whh_p.size) * itemsize(cdt)
                           + h0_p.size * itemsize(h0_p.dtype)),
    )

    kernel = functools.partial(_gru_kernel, t_chunk=Tc, hp=Hp)

    hs_pad = pl.pallas_call(
        kernel,
        out_shape=jax.ShapeDtypeStruct((Tp, Bp, Hp), odt),
        grid_spec=grid_spec,
        compiler_params=pltpu.CompilerParams(
            dimension_semantics=("parallel", "arbitrary"),
            vmem_limit_bytes=vmem_limit,
        ),
        cost_estimate=cost,
    )(acts, h0_p, whrz_p, whh_p)

    hiddens = hs_pad[:T, :B, :H]
    last_h = hiddens[T - 1]
    return hiddens, last_h


def gru_reference(X, h0, params):
    """Pure-JAX reference matching the PyTorch forward (mask=None)."""
    W_x_rz, W_h_rz, b_rz = params["W_x_rz"], params["W_h_rz"], params["b_rz"]
    W_xh, W_hh, b_h = params["W_xh"], params["W_hh"], params["b_h"]
    H = h0.shape[1]

    X_4rz = jnp.einsum("tbd,kd->tbk", X, W_x_rz) + b_rz
    X_4h = jnp.einsum("tbd,kd->tbk", X, W_xh) + b_h

    def step(h, inputs):
        x_rz, x_h = inputs
        rz = jax.nn.sigmoid(x_rz + h @ W_h_rz.T)
        r, z = rz[:, :H], rz[:, H:]
        gh = jnp.tanh(x_h + (r * h) @ W_hh.T)
        h_new = (1.0 - z) * h + z * gh
        return h_new, h_new

    last_h, hs = jax.lax.scan(step, h0, (X_4rz, X_4h))
    return hs, last_h


def init_gru_params(key, input_size, hidden_size, dtype=jnp.float32):
    """Deterministic init mirroring the PyTorch module's orthogonal init."""
    k1, k2, k3 = jax.random.split(key, 3)
    ortho = jax.nn.initializers.orthogonal()
    return {
        "W_x_rz": ortho(k1, (2 * hidden_size, input_size), dtype),
        "W_h_rz": ortho(k2, (2 * hidden_size, hidden_size), dtype),
        "b_rz": jnp.zeros((2 * hidden_size,), dtype),
        "W_xh": ortho(k3, (hidden_size, input_size), dtype),
        "W_hh": ortho(jax.random.fold_in(key, 7), (hidden_size, hidden_size), dtype),
        "b_h": jnp.zeros((hidden_size,), dtype),
    }


if __name__ == "__main__":
    T, B, D, H = 8, 2, 16, 32

    key = jax.random.PRNGKey(0)
    kx, kh, kp = jax.random.split(key, 3)
    X = jax.random.normal(kx, (T, B, D), jnp.float32)
    h0 = jax.random.normal(kh, (B, H), jnp.float32)
    params = init_gru_params(kp, D, H)

    # TODO(synk): the optional `mask` argument of the PyTorch forward is not
    # implemented (the common mask=None path is reproduced exactly).

    # f32 path: exact semantics check against the pure-JAX reference.
    hiddens, last_h = gru_forward(X, h0, params)
    jax.block_until_ready((hiddens, last_h))

    ref_hiddens, ref_last = gru_reference(X, h0, params)
    assert hiddens.shape == (T, B, H) and last_h.shape == (B, H)
    assert jnp.allclose(hiddens, ref_hiddens, atol=1e-4, rtol=1e-4)
    assert jnp.allclose(last_h, ref_last, atol=1e-4, rtol=1e-4)

    # bf16 path: bf16 matmuls + bf16 acts stream + bf16 hiddens writeback;
    # gate math and the hidden-state carry remain f32.  NOTE: error grows
    # with the recurrence length T -- validate on realistic T before making
    # bf16 the default.
    hb, lb = gru_forward(X, h0, params, compute_dtype=jnp.bfloat16,
                         out_dtype=jnp.bfloat16)
    jax.block_until_ready((hb, lb))
    assert hb.shape == (T, B, H) and lb.shape == (B, H)
    assert jnp.allclose(hb.astype(jnp.float32), ref_hiddens, atol=1e-1, rtol=5e-2)

    print("KERNEL_OK")
</pallas_src>

<mosaic_0001>
module attributes {stable_mosaic.version = 11 : i64} {
  func.func @_gru_kernel(%arg0: i32, %arg1: i32, %arg2: memref<8x8x384xf32, #tpu.memory_space<vmem>>, %arg3: memref<8x128xf32, #tpu.memory_space<vmem>>, %arg4: memref<128x256xf32, #tpu.memory_space<vmem>>, %arg5: memref<128x128xf32, #tpu.memory_space<vmem>>, %arg6: memref<8x8x128xf32, #tpu.memory_space<vmem>>, %arg7: memref<8x128xf32, #tpu.memory_space<vmem>>) attributes {dimension_semantics = [#tpu.dimension_semantics<parallel>, #tpu.dimension_semantics<arbitrary>], iteration_bounds = array<i64: 1, 1>, scalar_prefetch = 0 : i64, scratch_operands = 1 : i64, tpu.core_type = #tpu.core_type<tc>, window_params = [{transform_indices = @transform_0, window_bounds = array<i64: 8, 8, 384>}, {transform_indices = @transform_1, window_bounds = array<i64: 8, 128>}, {pipeline_mode = #tpu.pipeline_mode<synchronous>, transform_indices = @transform_2, window_bounds = array<i64: 128, 256>}, {pipeline_mode = #tpu.pipeline_mode<synchronous>, transform_indices = @transform_3, window_bounds = array<i64: 128, 128>}, {transform_indices = @transform_4, window_bounds = array<i64: 8, 8, 128>}]} {
    %c0_i32 = arith.constant 0 : i32
    %0 = arith.cmpi eq, %arg1, %c0_i32 : i32
    %1 = arith.extui %0 : i1 to i32
    %c0_i32_0 = arith.constant 0 : i32
    %2 = arith.cmpi ne, %1, %c0_i32_0 : i32
    scf.if %2 {
      %c0_92 = arith.constant 0 : index
      %c0_93 = arith.constant 0 : index
      %221 = vector.load %arg3[%c0_92, %c0_93] : memref<8x128xf32, #tpu.memory_space<vmem>>, vector<8x128xf32>
      %c0_94 = arith.constant 0 : index
      %c0_95 = arith.constant 0 : index
      %222 = vector.load %arg7[%c0_94, %c0_95] : memref<8x128xf32, #tpu.memory_space<vmem>>, vector<8x128xf32>
      tpu.vector_store %arg7[%c0_94, %c0_95], %221 {strides = array<i32>} : memref<8x128xf32, #tpu.memory_space<vmem>>, vector<8x128xf32>,
    } else {
    }
    %c0 = arith.constant 0 : index
    %c0_1 = arith.constant 0 : index
    %3 = vector.load %arg4[%c0, %c0_1] : memref<128x256xf32, #tpu.memory_space<vmem>>, vector<128x256xf32>
    %c0_2 = arith.constant 0 : index
    %c0_3 = arith.constant 0 : index
    %4 = vector.load %arg5[%c0_2, %c0_3] : memref<128x128xf32, #tpu.memory_space<vmem>>, vector<128x128xf32>
    %c0_i32_4 = arith.constant 0 : i32
    %c0_5 = arith.constant 0 : index
    %c0_6 = arith.constant 0 : index
    %5 = vector.load %arg7[%c0_5, %c0_6] : memref<8x128xf32, #tpu.memory_space<vmem>>, vector<8x128xf32>
    %6 = arith.index_cast %c0_i32_4 : i32 to index
    %c0_7 = arith.constant 0 : index
    %c0_8 = arith.constant 0 : index
    %7 = vector.load %arg2[%6, %c0_7, %c0_8] : memref<8x8x384xf32, #tpu.memory_space<vmem>>, vector<1x8x384xf32>
    %8 = vector.shape_cast %7 : vector<1x8x384xf32> to vector<8x384xf32>
    %cst = arith.constant dense<0.000000e+00> : vector<8x256xf32>
    %9 = tpu.matmul %5, %3, %cst {dimension_numbers = #tpu.dot_dimension_numbers<[1], [0], [0], [1], [0, 0, 1, 1], [], []>} : vector<8x128xf32>, vector<128x256xf32>, vector<8x256xf32> -> vector<8x256xf32>
    %10 = vector.extract_strided_slice %8 {offsets = [0, 0], sizes = [8, 256], strides = [1, 1]} : vector<8x384xf32> to vector<8x256xf32>
    %11 = arith.addf %9, %10 : vector<8x256xf32>
    %12 = arith.negf %11 : vector<8x256xf32>
    %13 = math.exp %12 : vector<8x256xf32>
    %cst_9 = arith.constant 1.000000e+00 : f32
    %14 = vector.broadcast %cst_9 : f32 to vector<8x256xf32>
    %15 = arith.addf %14, %13 : vector<8x256xf32>
    %16 = arith.divf %14, %15 : vector<8x256xf32>
    %17 = vector.extract_strided_slice %16 {offsets = [0, 0], sizes = [8, 128], strides = [1, 1]} : vector<8x256xf32> to vector<8x128xf32>
    %18 = vector.extract_strided_slice %16 {offsets = [0, 128], sizes = [8, 128], strides = [1, 1]} : vector<8x256xf32> to vector<8x128xf32>
    %19 = arith.mulf %17, %5 : vector<8x128xf32>
    %cst_10 = arith.constant dense<0.000000e+00> : vector<8x128xf32>
    %20 = tpu.matmul %19, %4, %cst_10 {dimension_numbers = #tpu.dot_dimension_numbers<[1], [0], [0], [1], [0, 0, 1, 1], [], []>} : vector<8x128xf32>, vector<128x128xf32>, vector<8x128xf32> -> vector<8x128xf32>
    %21 = vector.extract_strided_slice %8 {offsets = [0, 256], sizes = [8, 128], strides = [1, 1]} : vector<8x384xf32> to vector<8x128xf32>
    %22 = arith.addf %20, %21 : vector<8x128xf32>
    %23 = math.tanh %22 : vector<8x128xf32>
    %24 = arith.subf %23, %5 : vector<8x128xf32>
    %25 = arith.mulf %18, %24 : vector<8x128xf32>
    %26 = arith.addf %5, %25 : vector<8x128xf32>
    %c0_11 = arith.constant 0 : index
    %c0_12 = arith.constant 0 : index
    %27 = vector.load %arg7[%c0_11, %c0_12] : memref<8x128xf32, #tpu.memory_space<vmem>>, vector<8x128xf32>
    tpu.vector_store %arg7[%c0_11, %c0_12], %26 {strides = array<i32>} : memref<8x128xf32, #tpu.memory_space<vmem>>, vector<8x128xf32>,
    %28 = arith.index_cast %c0_i32_4 : i32 to index
    %c0_13 = arith.constant 0 : index
    %c0_14 = arith.constant 0 : index
    %29 = vector.load %arg6[%28, %c0_13, %c0_14] : memref<8x8x128xf32, #tpu.memory_space<vmem>>, vector<1x8x128xf32>
    %30 = vector.shape_cast %29 : vector<1x8x128xf32> to vector<8x128xf32>
    %31 = vector.shape_cast %26 : vector<8x128xf32> to vector<1x8x128xf32>
    tpu.vector_store %arg6[%28, %c0_13, %c0_14], %31 {strides = array<i32>} : memref<8x8x128xf32, #tpu.memory_space<vmem>>, vector<1x8x128xf32>,
    %c1_i32 = arith.constant 1 : i32
    %c0_15 = arith.constant 0 : index
    %c0_16 = arith.constant 0 : index
    %32 = vector.load %arg7[%c0_15, %c0_16] : memref<8x128xf32, #tpu.memory_space<vmem>>, vector<8x128xf32>
    %33 = arith.index_cast %c1_i32 : i32 to index
    %c0_17 = arith.constant 0 : index
    %c0_18 = arith.constant 0 : index
    %34 = vector.load %arg2[%33, %c0_17, %c0_18] : memref<8x8x384xf32, #tpu.memory_space<vmem>>, vector<1x8x384xf32>
    %35 = vector.shape_cast %34 : vector<1x8x384xf32> to vector<8x384xf32>
    %cst_19 = arith.constant dense<0.000000e+00> : vector<8x256xf32>
    %36 = tpu.matmul %32, %3, %cst_19 {dimension_numbers = #tpu.dot_dimension_numbers<[1], [0], [0], [1], [0, 0, 1, 1], [], []>} : vector<8x128xf32>, vector<128x256xf32>, vector<8x256xf32> -> vector<8x256xf32>
    %37 = vector.extract_strided_slice %35 {offsets = [0, 0], sizes = [8, 256], strides = [1, 1]} : vector<8x384xf32> to vector<8x256xf32>
    %38 = arith.addf %36, %37 : vector<8x256xf32>
    %39 = arith.negf %38 : vector<8x256xf32>
    %40 = math.exp %39 : vector<8x256xf32>
    %cst_20 = arith.constant 1.000000e+00 : f32
    %41 = vector.broadcast %cst_20 : f32 to vector<8x256xf32>
    %42 = arith.addf %41, %40 : vector<8x256xf32>
    %43 = arith.divf %41, %42 : vector<8x256xf32>
    %44 = vector.extract_strided_slice %43 {offsets = [0, 0], sizes = [8, 128], strides = [1, 1]} : vector<8x256xf32> to vector<8x128xf32>
    %45 = vector.extract_strided_slice %43 {offsets = [0, 128], sizes = [8, 128], strides = [1, 1]} : vector<8x256xf32> to vector<8x128xf32>
    %46 = arith.mulf %44, %32 : vector<8x128xf32>
    %cst_21 = arith.constant dense<0.000000e+00> : vector<8x128xf32>
    %47 = tpu.matmul %46, %4, %cst_21 {dimension_numbers = #tpu.dot_dimension_numbers<[1], [0], [0], [1], [0, 0, 1, 1], [], []>} : vector<8x128xf32>, vector<128x128xf32>, vector<8x128xf32> -> vector<8x128xf32>
    %48 = vector.extract_strided_slice %35 {offsets = [0, 256], sizes = [8, 128], strides = [1, 1]} : vector<8x384xf32> to vector<8x128xf32>
    %49 = arith.addf %47, %48 : vector<8x128xf32>
    %50 = math.tanh %49 : vector<8x128xf32>
    %51 = arith.subf %50, %32 : vector<8x128xf32>
    %52 = arith.mulf %45, %51 : vector<8x128xf32>
    %53 = arith.addf %32, %52 : vector<8x128xf32>
    %c0_22 = arith.constant 0 : index
    %c0_23 = arith.constant 0 : index
    %54 = vector.load %arg7[%c0_22, %c0_23] : memref<8x128xf32, #tpu.memory_space<vmem>>, vector<8x128xf32>
    tpu.vector_store %arg7[%c0_22, %c0_23], %53 {strides = array<i32>} : memref<8x128xf32, #tpu.memory_space<vmem>>, vector<8x128xf32>,
    %55 = arith.index_cast %c1_i32 : i32 to index
    %c0_24 = arith.constant 0 : index
    %c0_25 = arith.constant 0 : index
    %56 = vector.load %arg6[%55, %c0_24, %c0_25] : memref<8x8x128xf32, #tpu.memory_space<vmem>>, vector<1x8x128xf32>
    %57 = vector.shape_cast %56 : vector<1x8x128xf32> to vector<8x128xf32>
    %58 = vector.shape_cast %53 : vector<8x128xf32> to vector<1x8x128xf32>
    tpu.vector_store %arg6[%55, %c0_24, %c0_25], %58 {strides = array<i32>} : memref<8x8x128xf32, #tpu.memory_space<vmem>>, vector<1x8x128xf32>,
    %c2_i32 = arith.constant 2 : i32
    %c0_26 = arith.constant 0 : index
    %c0_27 = arith.constant 0 : index
    %59 = vector.load %arg7[%c0_26, %c0_27] : memref<8x128xf32, #tpu.memory_space<vmem>>, vector<8x128xf32>
    %60 = arith.index_cast %c2_i32 : i32 to index
    %c0_28 = arith.constant 0 : index
    %c0_29 = arith.constant 0 : index
    %61 = vector.load %arg2[%60, %c0_28, %c0_29] : memref<8x8x384xf32, #tpu.memory_space<vmem>>, vector<1x8x384xf32>
    %62 = vector.shape_cast %61 : vector<1x8x384xf32> to vector<8x384xf32>
    %cst_30 = arith.constant dense<0.000000e+00> : vector<8x256xf32>
    %63 = tpu.matmul %59, %3, %cst_30 {dimension_numbers = #tpu.dot_dimension_numbers<[1], [0], [0], [1], [0, 0, 1, 1], [], []>} : vector<8x128xf32>, vector<128x256xf32>, vector<8x256xf32> -> vector<8x256xf32>
    %64 = vector.extract_strided_slice %62 {offsets = [0, 0], sizes = [8, 256], strides = [1, 1]} : vector<8x384xf32> to vector<8x256xf32>
    %65 = arith.addf %63, %64 : vector<8x256xf32>
    %66 = arith.negf %65 : vector<8x256xf32>
    %67 = math.exp %66 : vector<8x256xf32>
    %cst_31 = arith.constant 1.000000e+00 : f32
    %68 = vector.broadcast %cst_31 : f32 to vector<8x256xf32>
    %69 = arith.addf %68, %67 : vector<8x256xf32>
    %70 = arith.divf %68, %69 : vector<8x256xf32>
    %71 = vector.extract_strided_slice %70 {offsets = [0, 0], sizes = [8, 128], strides = [1, 1]} : vector<8x256xf32> to vector<8x128xf32>
    %72 = vector.extract_strided_slice %70 {offsets = [0, 128], sizes = [8, 128], strides = [1, 1]} : vector<8x256xf32> to vector<8x128xf32>
    %73 = arith.mulf %71, %59 : vector<8x128xf32>
    %cst_32 = arith.constant dense<0.000000e+00> : vector<8x128xf32>
    %74 = tpu.matmul %73, %4, %cst_32 {dimension_numbers = #tpu.dot_dimension_numbers<[1], [0], [0], [1], [0, 0, 1, 1], [], []>} : vector<8x128xf32>, vector<128x128xf32>, vector<8x128xf32> -> vector<8x128xf32>
    %75 = vector.extract_strided_slice %62 {offsets = [0, 256], sizes = [8, 128], strides = [1, 1]} : vector<8x384xf32> to vector<8x128xf32>
    %76 = arith.addf %74, %75 : vector<8x128xf32>
    %77 = math.tanh %76 : vector<8x128xf32>
    %78 = arith.subf %77, %59 : vector<8x128xf32>
    %79 = arith.mulf %72, %78 : vector<8x128xf32>
    %80 = arith.addf %59, %79 : vector<8x128xf32>
    %c0_33 = arith.constant 0 : index
    %c0_34 = arith.constant 0 : index
    %81 = vector.load %arg7[%c0_33, %c0_34] : memref<8x128xf32, #tpu.memory_space<vmem>>, vector<8x128xf32>
    tpu.vector_store %arg7[%c0_33, %c0_34], %80 {strides = array<i32>} : memref<8x128xf32, #tpu.memory_space<vmem>>, vector<8x128xf32>,
    %82 = arith.index_cast %c2_i32 : i32 to index
    %c0_35 = arith.constant 0 : index
    %c0_36 = arith.constant 0 : index
    %83 = vector.load %arg6[%82, %c0_35, %c0_36] : memref<8x8x128xf32, #tpu.memory_space<vmem>>, vector<1x8x128xf32>
    %84 = vector.shape_cast %83 : vector<1x8x128xf32> to vector<8x128xf32>
    %85 = vector.shape_cast %80 : vector<8x128xf32> to vector<1x8x128xf32>
    tpu.vector_store %arg6[%82, %c0_35, %c0_36], %85 {strides = array<i32>} : memref<8x8x128xf32, #tpu.memory_space<vmem>>, vector<1x8x128xf32>,
    %c3_i32 = arith.constant 3 : i32
    %c0_37 = arith.constant 0 : index
    %c0_38 = arith.constant 0 : index
    %86 = vector.load %arg7[%c0_37, %c0_38] : memref<8x128xf32, #tpu.memory_space<vmem>>, vector<8x128xf32>
    %87 = arith.index_cast %c3_i32 : i32 to index
    %c0_39 = arith.constant 0 : index
    %c0_40 = arith.constant 0 : index
    %88 = vector.load %arg2[%87, %c0_39, %c0_40] : memref<8x8x384xf32, #tpu.memory_space<vmem>>, vector<1x8x384xf32>
    %89 = vector.shape_cast %88 : vector<1x8x384xf32> to vector<8x384xf32>
    %cst_41 = arith.constant dense<0.000000e+00> : vector<8x256xf32>
    %90 = tpu.matmul %86, %3, %cst_41 {dimension_numbers = #tpu.dot_dimension_numbers<[1], [0], [0], [1], [0, 0, 1, 1], [], []>} : vector<8x128xf32>, vector<128x256xf32>, vector<8x256xf32> -> vector<8x256xf32>
    %91 = vector.extract_strided_slice %89 {offsets = [0, 0], sizes = [8, 256], strides = [1, 1]} : vector<8x384xf32> to vector<8x256xf32>
    %92 = arith.addf %90, %91 : vector<8x256xf32>
    %93 = arith.negf %92 : vector<8x256xf32>
    %94 = math.exp %93 : vector<8x256xf32>
    %cst_42 = arith.constant 1.000000e+00 : f32
    %95 = vector.broadcast %cst_42 : f32 to vector<8x256xf32>
    %96 = arith.addf %95, %94 : vector<8x256xf32>
    %97 = arith.divf %95, %96 : vector<8x256xf32>
    %98 = vector.extract_strided_slice %97 {offsets = [0, 0], sizes = [8, 128], strides = [1, 1]} : vector<8x256xf32> to vector<8x128xf32>
    %99 = vector.extract_strided_slice %97 {offsets = [0, 128], sizes = [8, 128], strides = [1, 1]} : vector<8x256xf32> to vector<8x128xf32>
    %100 = arith.mulf %98, %86 : vector<8x128xf32>
    %cst_43 = arith.constant dense<0.000000e+00> : vector<8x128xf32>
    %101 = tpu.matmul %100, %4, %cst_43 {dimension_numbers = #tpu.dot_dimension_numbers<[1], [0], [0], [1], [0, 0, 1, 1], [], []>} : vector<8x128xf32>, vector<128x128xf32>, vector<8x128xf32> -> vector<8x128xf32>
    %102 = vector.extract_strided_slice %89 {offsets = [0, 256], sizes = [8, 128], strides = [1, 1]} : vector<8x384xf32> to vector<8x128xf32>
    %103 = arith.addf %101, %102 : vector<8x128xf32>
    %104 = math.tanh %103 : vector<8x128xf32>
    %105 = arith.subf %104, %86 : vector<8x128xf32>
    %106 = arith.mulf %99, %105 : vector<8x128xf32>
    %107 = arith.addf %86, %106 : vector<8x128xf32>
    %c0_44 = arith.constant 0 : index
    %c0_45 = arith.constant 0 : index
    %108 = vector.load %arg7[%c0_44, %c0_45] : memref<8x128xf32, #tpu.memory_space<vmem>>, vector<8x128xf32>
    tpu.vector_store %arg7[%c0_44, %c0_45], %107 {strides = array<i32>} : memref<8x128xf32, #tpu.memory_space<vmem>>, vector<8x128xf32>,
    %109 = arith.index_cast %c3_i32 : i32 to index
    %c0_46 = arith.constant 0 : index
    %c0_47 = arith.constant 0 : index
    %110 = vector.load %arg6[%109, %c0_46, %c0_47] : memref<8x8x128xf32, #tpu.memory_space<vmem>>, vector<1x8x128xf32>
    %111 = vector.shape_cast %110 : vector<1x8x128xf32> to vector<8x128xf32>
    %112 = vector.shape_cast %107 : vector<8x128xf32> to vector<1x8x128xf32>
    tpu.vector_store %arg6[%109, %c0_46, %c0_47], %112 {strides = array<i32>} : memref<8x8x128xf32, #tpu.memory_space<vmem>>, vector<1x8x128xf32>,
    %c4_i32 = arith.constant 4 : i32
    %c0_48 = arith.constant 0 : index
    %c0_49 = arith.constant 0 : index
    %113 = vector.load %arg7[%c0_48, %c0_49] : memref<8x128xf32, #tpu.memory_space<vmem>>, vector<8x128xf32>
    %114 = arith.index_cast %c4_i32 : i32 to index
    %c0_50 = arith.constant 0 : index
    %c0_51 = arith.constant 0 : index
    %115 = vector.load %arg2[%114, %c0_50, %c0_51] : memref<8x8x384xf32, #tpu.memory_space<vmem>>, vector<1x8x384xf32>
    %116 = vector.shape_cast %115 : vector<1x8x384xf32> to vector<8x384xf32>
    %cst_52 = arith.constant dense<0.000000e+00> : vector<8x256xf32>
    %117 = tpu.matmul %113, %3, %cst_52 {dimension_numbers = #tpu.dot_dimension_numbers<[1], [0], [0], [1], [0, 0, 1, 1], [], []>} : vector<8x128xf32>, vector<128x256xf32>, vector<8x256xf32> -> vector<8x256xf32>
    %118 = vector.extract_strided_slice %116 {offsets = [0, 0], sizes = [8, 256], strides = [1, 1]} : vector<8x384xf32> to vector<8x256xf32>
    %119 = arith.addf %117, %118 : vector<8x256xf32>
    %120 = arith.negf %119 : vector<8x256xf32>
    %121 = math.exp %120 : vector<8x256xf32>
    %cst_53 = arith.constant 1.000000e+00 : f32
    %122 = vector.broadcast %cst_53 : f32 to vector<8x256xf32>
    %123 = arith.addf %122, %121 : vector<8x256xf32>
    %124 = arith.divf %122, %123 : vector<8x256xf32>
    %125 = vector.extract_strided_slice %124 {offsets = [0, 0], sizes = [8, 128], strides = [1, 1]} : vector<8x256xf32> to vector<8x128xf32>
    %126 = vector.extract_strided_slice %124 {offsets = [0, 128], sizes = [8, 128], strides = [1, 1]} : vector<8x256xf32> to vector<8x128xf32>
    %127 = arith.mulf %125, %113 : vector<8x128xf32>
    %cst_54 = arith.constant dense<0.000000e+00> : vector<8x128xf32>
    %128 = tpu.matmul %127, %4, %cst_54 {dimension_numbers = #tpu.dot_dimension_numbers<[1], [0], [0], [1], [0, 0, 1, 1], [], []>} : vector<8x128xf32>, vector<128x128xf32>, vector<8x128xf32> -> vector<8x128xf32>
    %129 = vector.extract_strided_slice %116 {offsets = [0, 256], sizes = [8, 128], strides = [1, 1]} : vector<8x384xf32> to vector<8x128xf32>
    %130 = arith.addf %128, %129 : vector<8x128xf32>
    %131 = math.tanh %130 : vector<8x128xf32>
    %132 = arith.subf %131, %113 : vector<8x128xf32>
    %133 = arith.mulf %126, %132 : vector<8x128xf32>
    %134 = arith.addf %113, %133 : vector<8x128xf32>
    %c0_55 = arith.constant 0 : index
    %c0_56 = arith.constant 0 : index
    %135 = vector.load %arg7[%c0_55, %c0_56] : memref<8x128xf32, #tpu.memory_space<vmem>>, vector<8x128xf32>
    tpu.vector_store %arg7[%c0_55, %c0_56], %134 {strides = array<i32>} : memref<8x128xf32, #tpu.memory_space<vmem>>, vector<8x128xf32>,
    %136 = arith.index_cast %c4_i32 : i32 to index
    %c0_57 = arith.constant 0 : index
    %c0_58 = arith.constant 0 : index
    %137 = vector.load %arg6[%136, %c0_57, %c0_58] : memref<8x8x128xf32, #tpu.memory_space<vmem>>, vector<1x8x128xf32>
    %138 = vector.shape_cast %137 : vector<1x8x128xf32> to vector<8x128xf32>
    %139 = vector.shape_cast %134 : vector<8x128xf32> to vector<1x8x128xf32>
    tpu.vector_store %arg6[%136, %c0_57, %c0_58], %139 {strides = array<i32>} : memref<8x8x128xf32, #tpu.memory_space<vmem>>, vector<1x8x128xf32>,
    %c5_i32 = arith.constant 5 : i32
    %c0_59 = arith.constant 0 : index
    %c0_60 = arith.constant 0 : index
    %140 = vector.load %arg7[%c0_59, %c0_60] : memref<8x128xf32, #tpu.memory_space<vmem>>, vector<8x128xf32>
    %141 = arith.index_cast %c5_i32 : i32 to index
    %c0_61 = arith.constant 0 : index
    %c0_62 = arith.constant 0 : index
    %142 = vector.load %arg2[%141, %c0_61, %c0_62] : memref<8x8x384xf32, #tpu.memory_space<vmem>>, vector<1x8x384xf32>
    %143 = vector.shape_cast %142 : vector<1x8x384xf32> to vector<8x384xf32>
    %cst_63 = arith.constant dense<0.000000e+00> : vector<8x256xf32>
    %144 = tpu.matmul %140, %3, %cst_63 {dimension_numbers = #tpu.dot_dimension_numbers<[1], [0], [0], [1], [0, 0, 1, 1], [], []>} : vector<8x128xf32>, vector<128x256xf32>, vector<8x256xf32> -> vector<8x256xf32>
    %145 = vector.extract_strided_slice %143 {offsets = [0, 0], sizes = [8, 256], strides = [1, 1]} : vector<8x384xf32> to vector<8x256xf32>
    %146 = arith.addf %144, %145 : vector<8x256xf32>
    %147 = arith.negf %146 : vector<8x256xf32>
    %148 = math.exp %147 : vector<8x256xf32>
    %cst_64 = arith.constant 1.000000e+00 : f32
    %149 = vector.broadcast %cst_64 : f32 to vector<8x256xf32>
    %150 = arith.addf %149, %148 : vector<8x256xf32>
    %151 = arith.divf %149, %150 : vector<8x256xf32>
    %152 = vector.extract_strided_slice %151 {offsets = [0, 0], sizes = [8, 128], strides = [1, 1]} : vector<8x256xf32> to vector<8x128xf32>
    %153 = vector.extract_strided_slice %151 {offsets = [0, 128], sizes = [8, 128], strides = [1, 1]} : vector<8x256xf32> to vector<8x128xf32>
    %154 = arith.mulf %152, %140 : vector<8x128xf32>
    %cst_65 = arith.constant dense<0.000000e+00> : vector<8x128xf32>
    %155 = tpu.matmul %154, %4, %cst_65 {dimension_numbers = #tpu.dot_dimension_numbers<[1], [0], [0], [1], [0, 0, 1, 1], [], []>} : vector<8x128xf32>, vector<128x128xf32>, vector<8x128xf32> -> vector<8x128xf32>
    %156 = vector.extract_strided_slice %143 {offsets = [0, 256], sizes = [8, 128], strides = [1, 1]} : vector<8x384xf32> to vector<8x128xf32>
    %157 = arith.addf %155, %156 : vector<8x128xf32>
    %158 = math.tanh %157 : vector<8x128xf32>
    %159 = arith.subf %158, %140 : vector<8x128xf32>
    %160 = arith.mulf %153, %159 : vector<8x128xf32>
    %161 = arith.addf %140, %160 : vector<8x128xf32>
    %c0_66 = arith.constant 0 : index
    %c0_67 = arith.constant 0 : index
    %162 = vector.load %arg7[%c0_66, %c0_67] : memref<8x128xf32, #tpu.memory_space<vmem>>, vector<8x128xf32>
    tpu.vector_store %arg7[%c0_66, %c0_67], %161 {strides = array<i32>} : memref<8x128xf32, #tpu.memory_space<vmem>>, vector<8x128xf32>,
    %163 = arith.index_cast %c5_i32 : i32 to index
    %c0_68 = arith.constant 0 : index
    %c0_69 = arith.constant 0 : index
    %164 = vector.load %arg6[%163, %c0_68, %c0_69] : memref<8x8x128xf32, #tpu.memory_space<vmem>>, vector<1x8x128xf32>
    %165 = vector.shape_cast %164 : vector<1x8x128xf32> to vector<8x128xf32>
    %166 = vector.shape_cast %161 : vector<8x128xf32> to vector<1x8x128xf32>
    tpu.vector_store %arg6[%163, %c0_68, %c0_69], %166 {strides = array<i32>} : memref<8x8x128xf32, #tpu.memory_space<vmem>>, vector<1x8x128xf32>,
    %c6_i32 = arith.constant 6 : i32
    %c0_70 = arith.constant 0 : index
    %c0_71 = arith.constant 0 : index
    %167 = vector.load %arg7[%c0_70, %c0_71] : memref<8x128xf32, #tpu.memory_space<vmem>>, vector<8x128xf32>
    %168 = arith.index_cast %c6_i32 : i32 to index
    %c0_72 = arith.constant 0 : index
    %c0_73 = arith.constant 0 : index
    %169 = vector.load %arg2[%168, %c0_72, %c0_73] : memref<8x8x384xf32, #tpu.memory_space<vmem>>, vector<1x8x384xf32>
    %170 = vector.shape_cast %169 : vector<1x8x384xf32> to vector<8x384xf32>
    %cst_74 = arith.constant dense<0.000000e+00> : vector<8x256xf32>
    %171 = tpu.matmul %167, %3, %cst_74 {dimension_numbers = #tpu.dot_dimension_numbers<[1], [0], [0], [1], [0, 0, 1, 1], [], []>} : vector<8x128xf32>, vector<128x256xf32>, vector<8x256xf32> -> vector<8x256xf32>
    %172 = vector.extract_strided_slice %170 {offsets = [0, 0], sizes = [8, 256], strides = [1, 1]} : vector<8x384xf32> to vector<8x256xf32>
    %173 = arith.addf %171, %172 : vector<8x256xf32>
    %174 = arith.negf %173 : vector<8x256xf32>
    %175 = math.exp %174 : vector<8x256xf32>
    %cst_75 = arith.constant 1.000000e+00 : f32
    %176 = vector.broadcast %cst_75 : f32 to vector<8x256xf32>
    %177 = arith.addf %176, %175 : vector<8x256xf32>
    %178 = arith.divf %176, %177 : vector<8x256xf32>
    %179 = vector.extract_strided_slice %178 {offsets = [0, 0], sizes = [8, 128], strides = [1, 1]} : vector<8x256xf32> to vector<8x128xf32>
    %180 = vector.extract_strided_slice %178 {offsets = [0, 128], sizes = [8, 128], strides = [1, 1]} : vector<8x256xf32> to vector<8x128xf32>
    %181 = arith.mulf %179, %167 : vector<8x128xf32>
    %cst_76 = arith.constant dense<0.000000e+00> : vector<8x128xf32>
    %182 = tpu.matmul %181, %4, %cst_76 {dimension_numbers = #tpu.dot_dimension_numbers<[1], [0], [0], [1], [0, 0, 1, 1], [], []>} : vector<8x128xf32>, vector<128x128xf32>, vector<8x128xf32> -> vector<8x128xf32>
    %183 = vector.extract_strided_slice %170 {offsets = [0, 256], sizes = [8, 128], strides = [1, 1]} : vector<8x384xf32> to vector<8x128xf32>
    %184 = arith.addf %182, %183 : vector<8x128xf32>
    %185 = math.tanh %184 : vector<8x128xf32>
    %186 = arith.subf %185, %167 : vector<8x128xf32>
    %187 = arith.mulf %180, %186 : vector<8x128xf32>
    %188 = arith.addf %167, %187 : vector<8x128xf32>
    %c0_77 = arith.constant 0 : index
    %c0_78 = arith.constant 0 : index
    %189 = vector.load %arg7[%c0_77, %c0_78] : memref<8x128xf32, #tpu.memory_space<vmem>>, vector<8x128xf32>
    tpu.vector_store %arg7[%c0_77, %c0_78], %188 {strides = array<i32>} : memref<8x128xf32, #tpu.memory_space<vmem>>, vector<8x128xf32>,
    %190 = arith.index_cast %c6_i32 : i32 to index
    %c0_79 = arith.constant 0 : index
    %c0_80 = arith.constant 0 : index
    %191 = vector.load %arg6[%190, %c0_79, %c0_80] : memref<8x8x128xf32, #tpu.memory_space<vmem>>, vector<1x8x128xf32>
    %192 = vector.shape_cast %191 : vector<1x8x128xf32> to vector<8x128xf32>
    %193 = vector.shape_cast %188 : vector<8x128xf32> to vector<1x8x128xf32>
    tpu.vector_store %arg6[%190, %c0_79, %c0_80], %193 {strides = array<i32>} : memref<8x8x128xf32, #tpu.memory_space<vmem>>, vector<1x8x128xf32>,
    %c7_i32 = arith.constant 7 : i32
    %c0_81 = arith.constant 0 : index
    %c0_82 = arith.constant 0 : index
    %194 = vector.load %arg7[%c0_81, %c0_82] : memref<8x128xf32, #tpu.memory_space<vmem>>, vector<8x128xf32>
    %195 = arith.index_cast %c7_i32 : i32 to index
    %c0_83 = arith.constant 0 : index
    %c0_84 = arith.constant 0 : index
    %196 = vector.load %arg2[%195, %c0_83, %c0_84] : memref<8x8x384xf32, #tpu.memory_space<vmem>>, vector<1x8x384xf32>
    %197 = vector.shape_cast %196 : vector<1x8x384xf32> to vector<8x384xf32>
    %cst_85 = arith.constant dense<0.000000e+00> : vector<8x256xf32>
    %198 = tpu.matmul %194, %3, %cst_85 {dimension_numbers = #tpu.dot_dimension_numbers<[1], [0], [0], [1], [0, 0, 1, 1], [], []>} : vector<8x128xf32>, vector<128x256xf32>, vector<8x256xf32> -> vector<8x256xf32>
    %199 = vector.extract_strided_slice %197 {offsets = [0, 0], sizes = [8, 256], strides = [1, 1]} : vector<8x384xf32> to vector<8x256xf32>
    %200 = arith.addf %198, %199 : vector<8x256xf32>
    %201 = arith.negf %200 : vector<8x256xf32>
    %202 = math.exp %201 : vector<8x256xf32>
    %cst_86 = arith.constant 1.000000e+00 : f32
    %203 = vector.broadcast %cst_86 : f32 to vector<8x256xf32>
    %204 = arith.addf %203, %202 : vector<8x256xf32>
    %205 = arith.divf %203, %204 : vector<8x256xf32>
    %206 = vector.extract_strided_slice %205 {offsets = [0, 0], sizes = [8, 128], strides = [1, 1]} : vector<8x256xf32> to vector<8x128xf32>
    %207 = vector.extract_strided_slice %205 {offsets = [0, 128], sizes = [8, 128], strides = [1, 1]} : vector<8x256xf32> to vector<8x128xf32>
    %208 = arith.mulf %206, %194 : vector<8x128xf32>
    %cst_87 = arith.constant dense<0.000000e+00> : vector<8x128xf32>
    %209 = tpu.matmul %208, %4, %cst_87 {dimension_numbers = #tpu.dot_dimension_numbers<[1], [0], [0], [1], [0, 0, 1, 1], [], []>} : vector<8x128xf32>, vector<128x128xf32>, vector<8x128xf32> -> vector<8x128xf32>
    %210 = vector.extract_strided_slice %197 {offsets = [0, 256], sizes = [8, 128], strides = [1, 1]} : vector<8x384xf32> to vector<8x128xf32>
    %211 = arith.addf %209, %210 : vector<8x128xf32>
    %212 = math.tanh %211 : vector<8x128xf32>
    %213 = arith.subf %212, %194 : vector<8x128xf32>
    %214 = arith.mulf %207, %213 : vector<8x128xf32>
    %215 = arith.addf %194, %214 : vector<8x128xf32>
    %c0_88 = arith.constant 0 : index
    %c0_89 = arith.constant 0 : index
    %216 = vector.load %arg7[%c0_88, %c0_89] : memref<8x128xf32, #tpu.memory_space<vmem>>, vector<8x128xf32>
    tpu.vector_store %arg7[%c0_88, %c0_89], %215 {strides = array<i32>} : memref<8x128xf32, #tpu.memory_space<vmem>>, vector<8x128xf32>,
    %217 = arith.index_cast %c7_i32 : i32 to index
    %c0_90 = arith.constant 0 : index
    %c0_91 = arith.constant 0 : index
    %218 = vector.load %arg6[%217, %c0_90, %c0_91] : memref<8x8x128xf32, #tpu.memory_space<vmem>>, vector<1x8x128xf32>
    %219 = vector.shape_cast %218 : vector<1x8x128xf32> to vector<8x128xf32>
    %220 = vector.shape_cast %215 : vector<8x128xf32> to vector<1x8x128xf32>
    tpu.vector_store %arg6[%217, %c0_90, %c0_91], %220 {strides = array<i32>} : memref<8x8x128xf32, #tpu.memory_space<vmem>>, vector<1x8x128xf32>,
    %c8_i32 = arith.constant 8 : i32
    return
  }
  func.func @transform_0(%arg0: i32, %arg1: i32) -> (i32, i32, i32) {
    %c0_i32 = arith.constant 0 : i32
    %c0_i32_0 = arith.constant 0 : i32
    return %arg1, %arg0, %c0_i32 : i32, i32, i32
  }
  func.func @transform_1(%arg0: i32, %arg1: i32) -> (i32, i32) {
    %c0_i32 = arith.constant 0 : i32
    %c0_i32_0 = arith.constant 0 : i32
    return %arg0, %c0_i32 : i32, i32
  }
  func.func @transform_2(%arg0: i32, %arg1: i32) -> (i32, i32) {
    %c0_i32 = arith.constant 0 : i32
    %c0_i32_0 = arith.constant 0 : i32
    %c0_i32_1 = arith.constant 0 : i32
    return %c0_i32, %c0_i32_0 : i32, i32
  }
  func.func @transform_3(%arg0: i32, %arg1: i32) -> (i32, i32) {
    %c0_i32 = arith.constant 0 : i32
    %c0_i32_0 = arith.constant 0 : i32
    %c0_i32_1 = arith.constant 0 : i32
    return %c0_i32, %c0_i32_0 : i32, i32
  }
  func.func @transform_4(%arg0: i32, %arg1: i32) -> (i32, i32, i32) {
    %c0_i32 = arith.constant 0 : i32
    %c0_i32_0 = arith.constant 0 : i32
    return %arg1, %arg0, %c0_i32 : i32, i32, i32
  }
}

</mosaic_0001>

<bundles_post_ra>
// kernel: tpu_custom_call.1
= control target key start
LH: loop header
LB: loop body
LE: loop exit
PB: predicated region body
PF: predicated region fallthrough
CT: control target
= control target key end

     0   :  { %9 = vsyncpa [#allocation4], 0  ;;  %s2986_s0 = inlined_call_operand.hbm [shape: f32[8,8,384], index: 0, kind: input, shape index: {}]   ;;  %s2987_s1 = inlined_call_operand.hbm [shape: f32[8,128], index: 1, kind: input, shape index: {}]   ;;  %s2988_s2 = inlined_call_operand.hbm [shape: f32[128,256], index: 2, kind: input, shape index: {}]   ;;  %s2989_s3 = inlined_call_operand.hbm [shape: f32[128,128], index: 3, kind: input, shape index: {}]   ;;  %s2990_s4 = inlined_call_operand.hbm [shape: f32[8,8,128], index: 4, kind: output, shape index: {}]  }
   0x1   :  { %10 = vsyncpa [#allocation7], 0 }
   0x2   :  { %11 = vsyncpa [#allocation10], 0 }
   0x3   :  { %12 = vsyncpa [#allocation5], 0  ;;  %s2151_s15 = smov [#allocation6]   ;;  %s2152_s17 = smov [#allocation3]  }
   0x4   :  { %s31_s16 = sshll.u32 %s2151_s15, 4  ;;  %s18_s18 = sshll.u32 %s2152_s17, 4  ;;  %s32_s16 = int_to_ptr.vmem [resolvable:$true] %s31_s16  ;;  %s19_s18 = int_to_ptr.vmem [resolvable:$true] %s18_s18 }
   0x5   :  { %s2051_s19 = scalar_lea.vmem %s32_s16, 128  ;;  %p2056_p1 = scmp.lt.s32.totalorder %s32_s16, %s32_s16 }
   0x6   :  { %p2052_p0 = scmp.ne.s32.totalorder %s32_s16, %s2051_s19  ;;  %p2057_p2 = scmp.lt.s32.totalorder %s2051_s19, %s2051_s19 }
   0x8   :  { %p2058_p3 = por %p2057_p2, %p2056_p1 }
   0xa   :  { %p2059_p4 = pnand %p2058_p3, %p2052_p0 }
   0xc   :  { %2062 = shalt.err (!%p2059_p4)
}
   0xd   :  { %34 = dma.hbm_to_vmem [thread:$0]  %s2987_s1, 128, %s32_s16, [#allocation7]  }
   0xe   :  { %s2071_s22 = scalar_lea.vmem %s19_s18, 3072  ;;  %p2076_p6 = scmp.lt.s32.totalorder %s19_s18, %s19_s18 }
   0xf   :  { %p2072_p5 = scmp.ne.s32.totalorder %s19_s18, %s2071_s22  ;;  %p2077_p7 = scmp.lt.s32.totalorder %s2071_s22, %s2071_s22 }
  0x11   :  { %p2078_p8 = por %p2077_p7, %p2076_p6 }
  0x13   :  { %p2079_p9 = pnand %p2078_p8, %p2072_p5 }
  0x15   :  { %2082 = shalt.err (!%p2079_p9)
}
  0x16   :  { %s2153_s23 = smov 384   ;;  %s2154_s24 = smov 24  }
  0x17   :  { %24 = dma.hbm_to_vmem [thread:$0]  %s2986_s0, 3072, %s19_s18, [#allocation4], %s2153_s23, %s2153_s23, %s2154_s24  }
  0x18   :  { %s2155_s27 = smov [#allocation8]  }
  0x19   :  { %s40_s28 = sshll.u32 %s2155_s27, 4  ;;  %s41_s28 = int_to_ptr.vmem [resolvable:$true] %s40_s28 }
  0x1a   :  { %s2091_s29 = scalar_lea.vmem %s41_s28, 4096  ;;  %p2096_p11 = scmp.lt.s32.totalorder %s41_s28, %s41_s28 }
  0x1b   :  { %p2092_p10 = scmp.ne.s32.totalorder %s41_s28, %s2091_s29  ;;  %p2097_p12 = scmp.lt.s32.totalorder %s2091_s29, %s2091_s29 }
  0x1d   :  { %p2098_p13 = por %p2097_p12, %p2096_p11 }
  0x1f   :  { %p2099_p0 = pnand %p2098_p13, %p2092_p10 }
  0x21   :  { %2102 = shalt.err (!%p2099_p0)
}
  0x22   :  { %s2156_s1 = smov 256   ;;  %s2157_s30 = smov 16  }
  0x23   :  { %46 = dma.hbm_to_vmem [thread:$0]  %s2988_s2, 4096, %s41_s28, [#allocation7], %s2156_s1, %s2156_s1, %s2157_s30  }
  0x24   :  { %s2158_s7 = smov [#allocation9]  }
  0x25   :  { %s52_s8 = sshll.u32 %s2158_s7, 4  ;;  %s53_s8 = int_to_ptr.vmem [resolvable:$true] %s52_s8 }
  0x26   :  { %s2111_s0 = scalar_lea.vmem %s53_s8, 2048  ;;  %p2116_p2 = scmp.lt.s32.totalorder %s53_s8, %s53_s8 }
  0x27   :  { %p2112_p1 = scmp.ne.s32.totalorder %s53_s8, %s2111_s0  ;;  %p2117_p3 = scmp.lt.s32.totalorder %s2111_s0, %s2111_s0 }
  0x29   :  { %p2118_p4 = por %p2117_p3, %p2116_p2 }
  0x2b   :  { %p2119_p5 = pnand %p2118_p4, %p2112_p1 }
  0x2d   :  { %2122 = shalt.err (!%p2119_p5)
}
  0x2e   :  { %s2159_s9 = smov 128   ;;  %s2160_s10 = smov 8  }
  0x2f   :  { %58 = dma.hbm_to_vmem [thread:$0]  %s2989_s3, 2048, %s53_s8, [#allocation10], %s2159_s9, %s2159_s9, %s2160_s10  }
  0x30   :  { %2143 = dma.done.wait [#allocation4], 3072  }
  0x31   :  { %2144 = vsyncadd [#allocation4], 4294964224 }
  0x32   :  { %2145 = dma.done.wait [#allocation7], 4224  }
  0x33   :  { %2146 = vsyncadd [#allocation7], 4294963072 }
  0x34   :  { %2147 = dma.done.wait [#allocation10], 2048  }
  0x35   :  { %2148 = vsyncadd [#allocation10], 4294965248  ;;  %v2991_v0 = vmov 0.0   ;;  %v2206_v1 = vld [vmem:[#allocation8 + $0xf8] sm:$0xff]  ;;  %v2208_v2 = vld [vmem:[#allocation8 + $0xf0] sm:$0xff]  ;;  %vm2162_vm0 = vmmov 0  }
  0x36   :  { %193 = vmatprep.mubr.f32.mxu0 %v2991_v0  ;;  %1622 = vmatprep.subr.mxu1 %v2991_v0  ;;  %v2210_v3 = vld [vmem:[#allocation8 + $0xe8] sm:$0xff]  ;;  %v2213_v4 = vld [vmem:[#allocation8 + $0xe0] sm:$0xff]  ;;  %v2216_v5 = vld [vmem:[#allocation8 + $0xd8] sm:$0xff]  ;;  %s2163_s2 = smov [#allocation11]  }
  0x37   :  { %129 = vmatprep.subr.mxu0 %v2206_v1  ;;  %v2219_v6 = vld [vmem:[#allocation8 + $0xd0] sm:$0xff]  ;;  %v2222_v7 = vld [vmem:[#allocation8 + $0xc8] sm:$0xff]  ;;  %v2225_v8 = vld [vmem:[#allocation8 + $0xc0] sm:$0xff]  ;;  %1654 = vmatprep.mubr.msk.f32.mxu1 %vm2162_vm0, %v2991_v0  ;;  %s1456_s3 = sshll.u32 %s2163_s2, 4  ;;  %s1457_s3 = int_to_ptr.vmem [resolvable:$true] %s1456_s3 }
  0x38   :  { %130 = vmatpush1.msra.mxu0 %v2208_v2  ;;  %v2228_v9 = vld [vmem:[#allocation8 + $0xb8] sm:$0xff]  ;;  %v2231_v10 = vld [vmem:[#allocation8 + $0xb0] sm:$0xff]  ;;  %v2234_v11 = vld [vmem:[#allocation8 + $0xa8] sm:$0xff]  ;;  %s2123_s13 = scalar_lea.vmem %s1457_s3, 1024  ;;  %p2128_p7 = scmp.lt.s32.totalorder %s1457_s3, %s1457_s3 }
  0x39   :  { %131 = vmatprep.subr.mxu0 %v2210_v3  ;;  %v2237_v12 = vld [vmem:[#allocation8 + $0xa0] sm:$0xff]  ;;  %v2240_v13 = vld [vmem:[#allocation8 + $0x98] sm:$0xff]  ;;  %v2243_v14 = vld [vmem:[#allocation8 + $0x90] sm:$0xff]  ;;  %p2124_p6 = scmp.ne.s32.totalorder %s1457_s3, %s2123_s13  ;;  %p2129_p8 = scmp.lt.s32.totalorder %s2123_s13, %s2123_s13 }
  0x3a   :  { %132 = vmatpush1.msra.mxu0 %v2213_v4  ;;  %v2246_v15 = vld [vmem:[#allocation8 + $0x88] sm:$0xff]  ;;  %v2249_v16 = vld [vmem:[#allocation8 + $0x80] sm:$0xff]  ;;  %v2252_v17 = vld [vmem:[#allocation8 + $0x78] sm:$0xff] }
  0x3b   :  { %133 = vmatprep.subr.mxu0 %v2216_v5  ;;  %v2255_v18 = vld [vmem:[#allocation8 + $0x70] sm:$0xff]  ;;  %v2258_v19 = vld [vmem:[#allocation8 + $0x68] sm:$0xff]  ;;  %v2261_v20 = vld [vmem:[#allocation8 + $0x60] sm:$0xff]  ;;  %p2130_p9 = por %p2129_p8, %p2128_p7 }
  0x3c   :  { %134 = vmatpush1.msra.mxu0 %v2219_v6  ;;  %v2264_v21 = vld [vmem:[#allocation8 + $0x58] sm:$0xff]  ;;  %v2267_v22 = vld [vmem:[#allocation8 + $0x50] sm:$0xff]  ;;  %v2270_v23 = vld [vmem:[#allocation8 + $0x48] sm:$0xff] }
  0x3d   :  { %135 = vmatprep.subr.mxu0 %v2222_v7  ;;  %v2273_v24 = vld [vmem:[#allocation8 + $0x40] sm:$0xff]  ;;  %v2276_v25 = vld [vmem:[#allocation8 + $0x38] sm:$0xff]  ;;  %v2279_v26 = vld [vmem:[#allocation8 + $0x30] sm:$0xff]  ;;  %p2131_p10 = pnand %p2130_p9, %p2124_p6 }
  0x3e   :  { %136 = vmatpush1.msra.mxu0 %v2225_v8  ;;  %v2282_v27 = vld [vmem:[#allocation8 + $0x28] sm:$0xff]  ;;  %v2285_v28 = vld [vmem:[#allocation8 + $0x20] sm:$0xff]  ;;  %v2288_v29 = vld [vmem:[#allocation8 + $0x18] sm:$0xff] }
  0x3f   :  { %137 = vmatprep.subr.mxu0 %v2228_v9  ;;  %v2291_v30 = vld [vmem:[#allocation8 + $0x10] sm:$0xff]  ;;  %v2294_v31 = vld [vmem:[#allocation8 + $0x8] sm:$0xff]  ;;  %v2297_v32 = vld [vmem:[#allocation8] sm:$0xff] }
  0x40   :  { %138 = vmatpush1.msra.mxu0 %v2231_v10  ;;  %v2300_v33 = vld [vmem:[#allocation6] sm:$0xff]  ;;  %v2343_v35 = vld [vmem:[#allocation9 + $0x70] sm:$0xff]  ;;  %v2347_v36 = vld [vmem:[#allocation9 + $0x68] sm:$0xff] }
  0x41   :  { %139 = vmatprep.subr.mxu0 %v2234_v11  ;;  %v2339_v34 = vld [vmem:[#allocation9 + $0x78] sm:$0xff]  ;;  %v2351_v37 = vld [vmem:[#allocation9 + $0x60] sm:$0xff]  ;;  %v2359_v39 = vld [vmem:[#allocation9 + $0x50] sm:$0xff] }
  0x42   :  { %140 = vmatpush1.msra.mxu0 %v2237_v12  ;;  %1623 = vmatpush3.msra.mxu1 %v2339_v34  ;;  %v2355_v38 = vld [vmem:[#allocation9 + $0x58] sm:$0xff]  ;;  %v2363_v40 = vld [vmem:[#allocation9 + $0x48] sm:$0xff]  ;;  %v2367_v41 = vld [vmem:[#allocation9 + $0x40] sm:$0xff] }
  0x43   :  { %141 = vmatprep.subr.mxu0 %v2240_v13  ;;  %1624 = vmatprep.subr.mxu1 %v2991_v0  ;;  %v2371_v42 = vld [vmem:[#allocation9 + $0x38] sm:$0xff]  ;;  %v2375_v43 = vld [vmem:[#allocation9 + $0x30] sm:$0xff]  ;;  %v2377_v44 = vld [vmem:[#allocation9 + $0x28] sm:$0xff] }
  0x44   :  { %142 = vmatpush1.msra.mxu0 %v2243_v14  ;;  %1625 = vmatpush3.msra.mxu1 %v2343_v35  ;;  %v2383_v45 = vld [vmem:[#allocation9 + $0x20] sm:$0xff]  ;;  %v2387_v46 = vld [vmem:[#allocation9 + $0x18] sm:$0xff]  ;;  %v2391_v47 = vld [vmem:[#allocation9 + $0x10] sm:$0xff] }
  0x45   :  { %143 = vmatprep.subr.mxu0 %v2246_v15  ;;  %1626 = vmatprep.subr.mxu1 %v2991_v0  ;;  %v2395_v48 = vld [vmem:[#allocation9 + $0x8] sm:$0xff]  ;;  %v2399_v49 = vld [vmem:[#allocation9] sm:$0xff]  ;;  %v126_v50 = vld [vmem:[#allocation3] sm:$0xff] }
  0x46   :  { %144 = vmatpush1.msra.mxu0 %v2249_v16  ;;  %1627 = vmatpush3.msra.mxu1 %v2347_v36  ;;  %2995 = vst [vmem:[#allocation16_spill] sm:$0xff] %v2399_v49  ;;  %v127_v58 = vld [vmem:[#allocation3 + $0x8] sm:$0xff]  ;;  %v128_v63 = vld [vmem:[#allocation3 + $0x10] sm:$0xff] }
  0x47   :  { %145 = vmatprep.subr.mxu0 %v2252_v17  ;;  %1628 = vmatprep.subr.mxu1 %v2991_v0 }
  0x48   :  { %146 = vmatpush1.msra.mxu0 %v2255_v18  ;;  %1629 = vmatpush3.msra.mxu1 %v2351_v37 }
  0x49   :  { %147 = vmatprep.subr.mxu0 %v2258_v19  ;;  %1630 = vmatprep.subr.mxu1 %v2991_v0 }
  0x4a   :  { %148 = vmatpush1.msra.mxu0 %v2261_v20  ;;  %1631 = vmatpush3.msra.mxu1 %v2355_v38 }
  0x4b   :  { %149 = vmatprep.subr.mxu0 %v2264_v21  ;;  %1632 = vmatprep.subr.mxu1 %v2991_v0 }
  0x4c   :  { %150 = vmatpush1.msra.mxu0 %v2267_v22  ;;  %1633 = vmatpush3.msra.mxu1 %v2359_v39 }
  0x4d   :  { %151 = vmatprep.subr.mxu0 %v2270_v23  ;;  %1634 = vmatprep.subr.mxu1 %v2991_v0 }
  0x4e   :  { %152 = vmatpush1.msra.mxu0 %v2273_v24  ;;  %1635 = vmatpush3.msra.mxu1 %v2363_v40 }
  0x4f   :  { %153 = vmatprep.subr.mxu0 %v2276_v25  ;;  %1636 = vmatprep.subr.mxu1 %v2991_v0 }
  0x50   :  { %154 = vmatpush1.msra.mxu0 %v2279_v26  ;;  %1637 = vmatpush3.msra.mxu1 %v2367_v41 }
  0x51   :  { %155 = vmatprep.subr.mxu0 %v2282_v27  ;;  %1638 = vmatprep.subr.mxu1 %v2991_v0 }
  0x52   :  { %156 = vmatpush1.msra.mxu0 %v2285_v28  ;;  %1639 = vmatpush3.msra.mxu1 %v2371_v42 }
  0x53   :  { %157 = vmatprep.subr.mxu0 %v2288_v29  ;;  %1640 = vmatprep.subr.mxu1 %v2991_v0 }
  0x54   :  { %158 = vmatpush1.msra.mxu0 %v2291_v30  ;;  %1641 = vmatpush3.msra.mxu1 %v2375_v43 }
  0x55   :  { %159 = vmatprep.subr.mxu0 %v2294_v31  ;;  %1642 = vmatprep.subr.mxu1 %v2991_v0 }
  0x56   :  { %160 = vmatpush1.msra.mxu0 %v2297_v32  ;;  %1643 = vmatpush3.msra.mxu1 %v2377_v44 }
  0x57   :  { %194 = vmatmul.mubr.f32.vlgmr.msra.gmra.mxu0 %v2300_v33  ;;  %294 = vmatprep.subr.mxu0 %v2206_v1 }
  0x58   :  { %295 = vmatpush1.msra.mxu0 %v2208_v2  ;;  %358 = vmatprep.mubr.f32.mxu0 %v2991_v0 }
  0x59   :  { %296 = vmatprep.subr.mxu0 %v2210_v3  ;;  %1644 = vmatprep.subr.mxu1 %v2991_v0 }
  0x5a   :  { %297 = vmatpush1.msra.mxu0 %v2213_v4  ;;  %1645 = vmatpush3.msra.mxu1 %v2383_v45 }
  0x5b   :  { %298 = vmatprep.subr.mxu0 %v2216_v5  ;;  %1646 = vmatprep.subr.mxu1 %v2991_v0 }
  0x5c   :  { %299 = vmatpush1.msra.mxu0 %v2219_v6  ;;  %1647 = vmatpush3.msra.mxu1 %v2387_v46 }
  0x5d   :  { %300 = vmatprep.subr.mxu0 %v2222_v7  ;;  %1648 = vmatprep.subr.mxu1 %v2991_v0 }
  0x5e   :  { %301 = vmatpush1.msra.mxu0 %v2225_v8  ;;  %1649 = vmatpush3.msra.mxu1 %v2391_v47 }
  0x5f   :  { %302 = vmatprep.subr.mxu0 %v2228_v9  ;;  %1650 = vmatprep.subr.mxu1 %v2991_v0 }
  0x60   :  { %303 = vmatpush1.msra.mxu0 %v2231_v10  ;;  %1651 = vmatpush3.msra.mxu1 %v2395_v48 }
  0x61   :  { %304 = vmatprep.subr.mxu0 %v2234_v11  ;;  %1652 = vmatprep.subr.mxu1 %v2991_v0 }
  0x62   :  { %305 = vmatpush1.msra.mxu0 %v2237_v12  ;;  %1653 = vmatpush3.msra.mxu1 %v2399_v49 }
  0x63   :  { %306 = vmatprep.subr.mxu0 %v2240_v13  ;;  %1657 = vmatprep.subr.mxu1 %v2991_v0 }
  0x64   :  { %307 = vmatpush1.msra.mxu0 %v2243_v14 }
  0x65   :  { %308 = vmatprep.subr.mxu0 %v2246_v15 }
  0x66   :  { %309 = vmatpush1.msra.mxu0 %v2249_v16 }
  0x67   :  { %310 = vmatprep.subr.mxu0 %v2252_v17 }
  0x68   :  { %311 = vmatpush1.msra.mxu0 %v2255_v18 }
  0x69   :  { %312 = vmatprep.subr.mxu0 %v2258_v19 }
  0x6a   :  { %313 = vmatpush1.msra.mxu0 %v2261_v20 }
  0x6b   :  { %314 = vmatprep.subr.mxu0 %v2264_v21 }
  0x6c   :  { %315 = vmatpush1.msra.mxu0 %v2267_v22 }
  0x6d   :  { %316 = vmatprep.subr.mxu0 %v2270_v23 }
  0x6e   :  { %317 = vmatpush1.msra.mxu0 %v2273_v24 }
  0x6f   :  { %318 = vmatprep.subr.mxu0 %v2276_v25 }
  0x70   :  { %319 = vmatpush1.msra.mxu0 %v2279_v26 }
  0x71   :  { %320 = vmatprep.subr.mxu0 %v2282_v27 }
  0x72   :  { %321 = vmatpush1.msra.mxu0 %v2285_v28 }
  0x73   :  { %322 = vmatprep.subr.mxu0 %v2288_v29 }
  0x74   :  { %323 = vmatpush1.msra.mxu0 %v2291_v30 }
  0x75   :  { %324 = vmatprep.subr.mxu0 %v2294_v31 }
  0x76   :  { %325 = vmatpush1.msra.mxu0 %v2297_v32 }
  0x77   :  { %460 = vmatprep.subr.mxu0 %v2206_v1 }
 0x117   :  { %v195_v51 = vpop.f32.mrf.mxu0 }
 0x118   :  { %v196_v52 = vadd.f32 %v195_v51, %v126_v50 }
 0x119   :  { %v197_v59 = vpop.f32.mrf.mxu0 }
 0x11a   :  { %v1470_v53 = vmul.f32 -1.442695, %v196_v52  ;;  %v198_v60 = vadd.f32 %v197_v59, %v127_v58  ;;  %v2996_v58 = vmov 0.0  }
 0x11c   :  { %1915 = vpow2.f32 %v1470_v53  ;;  %v1471_v61 = vmul.f32 -1.442695, %v198_v60 }
 0x129   :  { %v1916_v54 = vpop.eup %1915 }
 0x12a   :  { %v206_v55 = vadd.f32 1.0, %v1916_v54 }
 0x12c   :  { %1917 = vrcp.f32 %v206_v55 }
 0x12d   :  { %1919 = vpow2.f32 %v1471_v61 }
 0x139   :  { %v1918_v56 = vpop.eup %1917 }
 0x13a   :  { %v212_v57 = vmul.f32 %v1918_v56, %v2300_v33  ;;  %v1920_v62 = vpop.eup %1919 }
 0x13b   :  { %v207_v51 = vadd.f32 1.0, %v1920_v62 }
 0x13c   :  { %1655 = vmatmul.mubr.f32.vlgmr.msra.gmra.mxu1 %v212_v57 }
 0x13d   :  { %1658 = vmatpush3.msra.mxu1 %v2339_v34  ;;  %1689 = vmatprep.mubr.msk.f32.mxu1 %vm2162_vm0, %v2991_v0 }
 0x13e   :  { %1659 = vmatprep.subr.mxu1 %v2991_v0 }
 0x13f   :  { %1660 = vmatpush3.msra.mxu1 %v2343_v35 }
 0x140   :  { %1661 = vmatprep.subr.mxu1 %v2991_v0 }
 0x141   :  { %1662 = vmatpush3.msra.mxu1 %v2347_v36 }
 0x142   :  { %1663 = vmatprep.subr.mxu1 %v2991_v0 }
 0x143   :  { %1664 = vmatpush3.msra.mxu1 %v2351_v37 }
 0x144   :  { %1665 = vmatprep.subr.mxu1 %v2991_v0 }
 0x145   :  { %1666 = vmatpush3.msra.mxu1 %v2355_v38 }
 0x146   :  { %1667 = vmatprep.subr.mxu1 %v2991_v0 }
 0x147   :  { %1668 = vmatpush3.msra.mxu1 %v2359_v39 }
 0x148   :  { %1669 = vmatprep.subr.mxu1 %v2991_v0 }
 0x149   :  { %1670 = vmatpush3.msra.mxu1 %v2363_v40 }
 0x14a   :  { %1671 = vmatprep.subr.mxu1 %v2991_v0 }
 0x14b   :  { %1672 = vmatpush3.msra.mxu1 %v2367_v41 }
 0x14c   :  { %1673 = vmatprep.subr.mxu1 %v2991_v0 }
 0x14d   :  { %1674 = vmatpush3.msra.mxu1 %v2371_v42 }
 0x14e   :  { %1675 = vmatprep.subr.mxu1 %v2991_v0 }
 0x14f   :  { %1676 = vmatpush3.msra.mxu1 %v2375_v43 }
 0x150   :  { %1677 = vmatprep.subr.mxu1 %v2991_v0 }
 0x151   :  { %1678 = vmatpush3.msra.mxu1 %v2377_v44 }
 0x152   :  { %1679 = vmatprep.subr.mxu1 %v2991_v0 }
 0x153   :  { %1680 = vmatpush3.msra.mxu1 %v2383_v45 }
 0x154   :  { %1681 = vmatprep.subr.mxu1 %v2991_v0 }
 0x155   :  { %1682 = vmatpush3.msra.mxu1 %v2387_v46 }
 0x156   :  { %1683 = vmatprep.subr.mxu1 %v2991_v0 }
 0x157   :  { %1684 = vmatpush3.msra.mxu1 %v2391_v47 }
 0x158   :  { %1685 = vmatprep.subr.mxu1 %v2991_v0 }
 0x159   :  { %1686 = vmatpush3.msra.mxu1 %v2395_v48 }
 0x15a   :  { %1687 = vmatprep.subr.mxu1 %v2991_v0 }
 0x15b   :  { %1688 = vmatpush3.msra.mxu1 %v2399_v49 }
 0x15c   :  { %1692 = vmatprep.subr.mxu1 %v2991_v0 }
 0x1fc   :  { %v279_v50 = vpop.f32.mrf.mxu1 }
 0x1fd   :  { %v280_v52 = vadd.f32 %v279_v50, %v128_v63 }
 0x1fe   :  { %v1656_v53 = vpop.f32.mrf.mxu1 }
 0x1ff   :  { %1921 = vtanh.f32 %v280_v52  ;;  %v292_v52 = vld [vmem:[#allocation3 + $0x20] sm:$0xff] }
 0x200   :  { %1923 = vrcp.f32 %v207_v51 }
 0x20c   :  { %v1922_v54 = vpop.eup %1921 }
 0x20d   :  { %v284_v55 = vsub.f32 %v1922_v54, %v2300_v33  ;;  %v1924_v56 = vpop.eup %1923 }
 0x20f   :  { %v285_v57 = vmul.f32 %v1924_v56, %v284_v55 }
 0x211   :  { %v2442_v0 = vadd.f32 %v285_v57, %v2300_v33  ;;  %v291_v33 = vld [vmem:[#allocation3 + $0x18] sm:$0xff]  ;;  %v293_v57 = vld [vmem:[#allocation3 + $0x28] sm:$0xff] }
 0x213   :  { %359 = vmatmul.mubr.f32.vlgmr.msra.gmra.mxu0 %v2442_v0  ;;  %288 = vst [vmem:[#allocation11] sm:$0xff] %v2442_v0 }
 0x214   :  { %461 = vmatpush1.msra.mxu0 %v2208_v2  ;;  %524 = vmatprep.mubr.f32.mxu0 %v2996_v58 }
 0x215   :  { %462 = vmatprep.subr.mxu0 %v2210_v3 }
 0x216   :  { %463 = vmatpush1.msra.mxu0 %v2213_v4 }
 0x217   :  { %464 = vmatprep.subr.mxu0 %v2216_v5 }
 0x218   :  { %465 = vmatpush1.msra.mxu0 %v2219_v6 }
 0x219   :  { %466 = vmatprep.subr.mxu0 %v2222_v7 }
 0x21a   :  { %467 = vmatpush1.msra.mxu0 %v2225_v8 }
 0x21b   :  { %468 = vmatprep.subr.mxu0 %v2228_v9 }
 0x21c   :  { %469 = vmatpush1.msra.mxu0 %v2231_v10 }
 0x21d   :  { %470 = vmatprep.subr.mxu0 %v2234_v11 }
 0x21e   :  { %471 = vmatpush1.msra.mxu0 %v2237_v12 }
 0x21f   :  { %472 = vmatprep.subr.mxu0 %v2240_v13 }
 0x220   :  { %473 = vmatpush1.msra.mxu0 %v2243_v14 }
 0x221   :  { %474 = vmatprep.subr.mxu0 %v2246_v15 }
 0x222   :  { %475 = vmatpush1.msra.mxu0 %v2249_v16 }
 0x223   :  { %476 = vmatprep.subr.mxu0 %v2252_v17 }
 0x224   :  { %477 = vmatpush1.msra.mxu0 %v2255_v18 }
 0x225   :  { %478 = vmatprep.subr.mxu0 %v2258_v19 }
 0x226   :  { %479 = vmatpush1.msra.mxu0 %v2261_v20 }
 0x227   :  { %480 = vmatprep.subr.mxu0 %v2264_v21 }
 0x228   :  { %481 = vmatpush1.msra.mxu0 %v2267_v22 }
 0x229   :  { %482 = vmatprep.subr.mxu0 %v2270_v23 }
 0x22a   :  { %483 = vmatpush1.msra.mxu0 %v2273_v24 }
 0x22b   :  { %484 = vmatprep.subr.mxu0 %v2276_v25 }
 0x22c   :  { %485 = vmatpush1.msra.mxu0 %v2279_v26 }
 0x22d   :  { %486 = vmatprep.subr.mxu0 %v2282_v27 }
 0x22e   :  { %487 = vmatpush1.msra.mxu0 %v2285_v28 }
 0x22f   :  { %488 = vmatprep.subr.mxu0 %v2288_v29 }
 0x230   :  { %489 = vmatpush1.msra.mxu0 %v2291_v30 }
 0x231   :  { %490 = vmatprep.subr.mxu0 %v2294_v31 }
 0x232   :  { %491 = vmatpush1.msra.mxu0 %v2297_v32 }
 0x233   :  { %626 = vmatprep.subr.mxu0 %v2206_v1 }
 0x2d3   :  { %v360_v59 = vpop.f32.mrf.mxu0 }
 0x2d4   :  { %v361_v60 = vadd.f32 %v360_v59, %v291_v33 }
 0x2d5   :  { %v362_v53 = vpop.f32.mrf.mxu0 }
 0x2d6   :  { %v1472_v61 = vmul.f32 -1.442695, %v361_v60  ;;  %v363_v54 = vadd.f32 %v362_v53, %v292_v52 }
 0x2d8   :  { %1925 = vpow2.f32 %v1472_v61  ;;  %v1473_v55 = vmul.f32 -1.442695, %v363_v54 }
 0x2e5   :  { %v1926_v62 = vpop.eup %1925 }
 0x2e6   :  { %v371_v63 = vadd.f32 1.0, %v1926_v62 }
 0x2e8   :  { %1927 = vrcp.f32 %v371_v63 }
 0x2e9   :  { %1929 = vpow2.f32 %v1473_v55 }
 0x2f5   :  { %v1928_v50 = vpop.eup %1927 }
 0x2f6   :  { %v377_v51 = vmul.f32 %v1928_v50, %v2442_v0  ;;  %v1930_v56 = vpop.eup %1929 }
 0x2f7   :  { %v372_v59 = vadd.f32 1.0, %v1930_v56 }
 0x2f8   :  { %1690 = vmatmul.mubr.f32.vlgmr.msra.gmra.mxu1 %v377_v51 }
 0x2f9   :  { %1693 = vmatpush3.msra.mxu1 %v2339_v34  ;;  %1724 = vmatprep.mubr.msk.f32.mxu1 %vm2162_vm0, %v2996_v58 }
 0x2fa   :  { %1694 = vmatprep.subr.mxu1 %v2996_v58 }
 0x2fb   :  { %1695 = vmatpush3.msra.mxu1 %v2343_v35 }
 0x2fc   :  { %1696 = vmatprep.subr.mxu1 %v2996_v58 }
 0x2fd   :  { %1697 = vmatpush3.msra.mxu1 %v2347_v36 }
 0x2fe   :  { %1698 = vmatprep.subr.mxu1 %v2996_v58 }
 0x2ff   :  { %1699 = vmatpush3.msra.mxu1 %v2351_v37 }
 0x300   :  { %1700 = vmatprep.subr.mxu1 %v2996_v58 }
 0x301   :  { %1701 = vmatpush3.msra.mxu1 %v2355_v38 }
 0x302   :  { %1702 = vmatprep.subr.mxu1 %v2996_v58 }
 0x303   :  { %1703 = vmatpush3.msra.mxu1 %v2359_v39 }
 0x304   :  { %1704 = vmatprep.subr.mxu1 %v2996_v58 }
 0x305   :  { %1705 = vmatpush3.msra.mxu1 %v2363_v40 }
 0x306   :  { %1706 = vmatprep.subr.mxu1 %v2996_v58 }
 0x307   :  { %1707 = vmatpush3.msra.mxu1 %v2367_v41 }
 0x308   :  { %1708 = vmatprep.subr.mxu1 %v2996_v58 }
 0x309   :  { %1709 = vmatpush3.msra.mxu1 %v2371_v42 }
 0x30a   :  { %1710 = vmatprep.subr.mxu1 %v2996_v58 }
 0x30b   :  { %1711 = vmatpush3.msra.mxu1 %v2375_v43 }
 0x30c   :  { %1712 = vmatprep.subr.mxu1 %v2996_v58 }
 0x30d   :  { %1713 = vmatpush3.msra.mxu1 %v2377_v44 }
 0x30e   :  { %1714 = vmatprep.subr.mxu1 %v2996_v58 }
 0x30f   :  { %1715 = vmatpush3.msra.mxu1 %v2383_v45 }
 0x310   :  { %1716 = vmatprep.subr.mxu1 %v2996_v58 }
 0x311   :  { %1717 = vmatpush3.msra.mxu1 %v2387_v46 }
 0x312   :  { %1718 = vmatprep.subr.mxu1 %v2996_v58 }
 0x313   :  { %1719 = vmatpush3.msra.mxu1 %v2391_v47 }
 0x314   :  { %1720 = vmatprep.subr.mxu1 %v2996_v58 }
 0x315   :  { %1721 = vmatpush3.msra.mxu1 %v2395_v48 }
 0x316   :  { %1722 = vmatprep.subr.mxu1 %v2996_v58 }
 0x317   :  { %1723 = vmatpush3.msra.mxu1 %v2399_v49 }
 0x318   :  { %1727 = vmatprep.subr.mxu1 %v2996_v58 }
 0x3b8   :  { %v444_v33 = vpop.f32.mrf.mxu1 }
 0x3b9   :  { %v445_v60 = vadd.f32 %v444_v33, %v293_v57 }
 0x3ba   :  { %v1691_v61 = vpop.f32.mrf.mxu1 }
 0x3bb   :  { %1931 = vtanh.f32 %v445_v60  ;;  %v458_v60 = vld [vmem:[#allocation3 + $0x38] sm:$0xff] }
 0x3bc   :  { %1933 = vrcp.f32 %v372_v59  ;;  %v2997_v59 = vld [vmem:[#allocation16_spill] sm:$0xff] }
 0x3c8   :  { %v1932_v62 = vpop.eup %1931 }
 0x3c9   :  { %v449_v63 = vsub.f32 %v1932_v62, %v2442_v0  ;;  %v1934_v50 = vpop.eup %1933 }
 0x3cb   :  { %v450_v51 = vmul.f32 %v1934_v50, %v449_v63 }
 0x3cd   :  { %v2516_v49 = vadd.f32 %v450_v51, %v2442_v0  ;;  %v457_v0 = vld [vmem:[#allocation3 + $0x30] sm:$0xff]  ;;  %v459_v51 = vld [vmem:[#allocation3 + $0x40] sm:$0xff] }
 0x3cf   :  { %525 = vmatmul.mubr.f32.vlgmr.msra.gmra.mxu0 %v2516_v49  ;;  %454 = vst [vmem:[#allocation11 + $0x8] sm:$0xff] %v2516_v49 }
 0x3d0   :  { %627 = vmatpush1.msra.mxu0 %v2208_v2  ;;  %690 = vmatprep.mubr.f32.mxu0 %v2996_v58 }
 0x3d1   :  { %628 = vmatprep.subr.mxu0 %v2210_v3 }
 0x3d2   :  { %629 = vmatpush1.msra.mxu0 %v2213_v4 }
 0x3d3   :  { %630 = vmatprep.subr.mxu0 %v2216_v5 }
 0x3d4   :  { %631 = vmatpush1.msra.mxu0 %v2219_v6 }
 0x3d5   :  { %632 = vmatprep.subr.mxu0 %v2222_v7 }
 0x3d6   :  { %633 = vmatpush1.msra.mxu0 %v2225_v8 }
 0x3d7   :  { %634 = vmatprep.subr.mxu0 %v2228_v9 }
 0x3d8   :  { %635 = vmatpush1.msra.mxu0 %v2231_v10 }
 0x3d9   :  { %636 = vmatprep.subr.mxu0 %v2234_v11 }
 0x3da   :  { %637 = vmatpush1.msra.mxu0 %v2237_v12 }
 0x3db   :  { %638 = vmatprep.subr.mxu0 %v2240_v13 }
 0x3dc   :  { %639 = vmatpush1.msra.mxu0 %v2243_v14 }
 0x3dd   :  { %640 = vmatprep.subr.mxu0 %v2246_v15 }
 0x3de   :  { %641 = vmatpush1.msra.mxu0 %v2249_v16 }
 0x3df   :  { %642 = vmatprep.subr.mxu0 %v2252_v17 }
 0x3e0   :  { %643 = vmatpush1.msra.mxu0 %v2255_v18 }
 0x3e1   :  { %644 = vmatprep.subr.mxu0 %v2258_v19 }
 0x3e2   :  { %645 = vmatpush1.msra.mxu0 %v2261_v20 }
 0x3e3   :  { %646 = vmatprep.subr.mxu0 %v2264_v21 }
 0x3e4   :  { %647 = vmatpush1.msra.mxu0 %v2267_v22 }
 0x3e5   :  { %648 = vmatprep.subr.mxu0 %v2270_v23 }
 0x3e6   :  { %649 = vmatpush1.msra.mxu0 %v2273_v24 }
 0x3e7   :  { %650 = vmatprep.subr.mxu0 %v2276_v25 }
 0x3e8   :  { %651 = vmatpush1.msra.mxu0 %v2279_v26 }
 0x3e9   :  { %652 = vmatprep.subr.mxu0 %v2282_v27 }
 0x3ea   :  { %653 = vmatpush1.msra.mxu0 %v2285_v28 }
 0x3eb   :  { %654 = vmatprep.subr.mxu0 %v2288_v29 }
 0x3ec   :  { %655 = vmatpush1.msra.mxu0 %v2291_v30 }
 0x3ed   :  { %656 = vmatprep.subr.mxu0 %v2294_v31 }
 0x3ee   :  { %657 = vmatpush1.msra.mxu0 %v2297_v32 }
 0x3ef   :  { %792 = vmatprep.subr.mxu0 %v2206_v1 }
 0x48f   :  { %v526_v52 = vpop.f32.mrf.mxu0 }
 0x490   :  { %v527_v53 = vadd.f32 %v526_v52, %v457_v0 }
 0x491   :  { %v528_v61 = vpop.f32.mrf.mxu0 }
 0x492   :  { %v1474_v54 = vmul.f32 -1.442695, %v527_v53  ;;  %v529_v62 = vadd.f32 %v528_v61, %v458_v60 }
 0x494   :  { %1935 = vpow2.f32 %v1474_v54  ;;  %v1475_v63 = vmul.f32 -1.442695, %v529_v62 }
 0x4a1   :  { %v1936_v55 = vpop.eup %1935 }
 0x4a2   :  { %v537_v56 = vadd.f32 1.0, %v1936_v55 }
 0x4a4   :  { %1937 = vrcp.f32 %v537_v56 }
 0x4a5   :  { %1939 = vpow2.f32 %v1475_v63 }
 0x4b1   :  { %v1938_v57 = vpop.eup %1937 }
 0x4b2   :  { %v543_v33 = vmul.f32 %v1938_v57, %v2516_v49  ;;  %v1940_v50 = vpop.eup %1939 }
 0x4b3   :  { %v538_v52 = vadd.f32 1.0, %v1940_v50 }
 0x4b4   :  { %1725 = vmatmul.mubr.f32.vlgmr.msra.gmra.mxu1 %v543_v33 }
 0x4b5   :  { %1728 = vmatpush3.msra.mxu1 %v2339_v34  ;;  %1759 = vmatprep.mubr.msk.f32.mxu1 %vm2162_vm0, %v2996_v58 }
 0x4b6   :  { %1729 = vmatprep.subr.mxu1 %v2996_v58 }
 0x4b7   :  { %1730 = vmatpush3.msra.mxu1 %v2343_v35 }
 0x4b8   :  { %1731 = vmatprep.subr.mxu1 %v2996_v58 }
 0x4b9   :  { %1732 = vmatpush3.msra.mxu1 %v2347_v36 }
 0x4ba   :  { %1733 = vmatprep.subr.mxu1 %v2996_v58 }
 0x4bb   :  { %1734 = vmatpush3.msra.mxu1 %v2351_v37 }
 0x4bc   :  { %1735 = vmatprep.subr.mxu1 %v2996_v58 }
 0x4bd   :  { %1736 = vmatpush3.msra.mxu1 %v2355_v38 }
 0x4be   :  { %1737 = vmatprep.subr.mxu1 %v2996_v58 }
 0x4bf   :  { %1738 = vmatpush3.msra.mxu1 %v2359_v39 }
 0x4c0   :  { %1739 = vmatprep.subr.mxu1 %v2996_v58 }
 0x4c1   :  { %1740 = vmatpush3.msra.mxu1 %v2363_v40 }
 0x4c2   :  { %1741 = vmatprep.subr.mxu1 %v2996_v58 }
 0x4c3   :  { %1742 = vmatpush3.msra.mxu1 %v2367_v41 }
 0x4c4   :  { %1743 = vmatprep.subr.mxu1 %v2996_v58 }
 0x4c5   :  { %1744 = vmatpush3.msra.mxu1 %v2371_v42 }
 0x4c6   :  { %1745 = vmatprep.subr.mxu1 %v2996_v58 }
 0x4c7   :  { %1746 = vmatpush3.msra.mxu1 %v2375_v43 }
 0x4c8   :  { %1747 = vmatprep.subr.mxu1 %v2996_v58 }
 0x4c9   :  { %1748 = vmatpush3.msra.mxu1 %v2377_v44 }
 0x4ca   :  { %1749 = vmatprep.subr.mxu1 %v2996_v58 }
 0x4cb   :  { %1750 = vmatpush3.msra.mxu1 %v2383_v45 }
 0x4cc   :  { %1751 = vmatprep.subr.mxu1 %v2996_v58 }
 0x4cd   :  { %1752 = vmatpush3.msra.mxu1 %v2387_v46 }
 0x4ce   :  { %1753 = vmatprep.subr.mxu1 %v2996_v58 }
 0x4cf   :  { %1754 = vmatpush3.msra.mxu1 %v2391_v47 }
 0x4d0   :  { %1755 = vmatprep.subr.mxu1 %v2996_v58 }
 0x4d1   :  { %1756 = vmatpush3.msra.mxu1 %v2395_v48 }
 0x4d2   :  { %1757 = vmatprep.subr.mxu1 %v2996_v58 }
 0x4d3   :  { %1758 = vmatpush3.msra.mxu1 %v2997_v59 }
 0x4d4   :  { %1762 = vmatprep.subr.mxu1 %v2996_v58 }
 0x574   :  { %v610_v0 = vpop.f32.mrf.mxu1 }
 0x575   :  { %v611_v53 = vadd.f32 %v610_v0, %v459_v51 }
 0x576   :  { %v1726_v54 = vpop.f32.mrf.mxu1 }
 0x577   :  { %1941 = vtanh.f32 %v611_v53 }
 0x578   :  { %1943 = vrcp.f32 %v538_v52  ;;  %v624_v52 = vld [vmem:[#allocation3 + $0x50] sm:$0xff] }
 0x584   :  { %v1942_v55 = vpop.eup %1941 }
 0x585   :  { %v615_v56 = vsub.f32 %v1942_v55, %v2516_v49  ;;  %v1944_v57 = vpop.eup %1943 }
 0x587   :  { %v616_v33 = vmul.f32 %v1944_v57, %v615_v56  ;;  %v625_v57 = vld [vmem:[#allocation3 + $0x58] sm:$0xff] }
 0x589   :  { %v2590_v59 = vadd.f32 %v616_v33, %v2516_v49  ;;  %v623_v49 = vld [vmem:[#allocation3 + $0x48] sm:$0xff] }
 0x58b   :  { %691 = vmatmul.mubr.f32.vlgmr.msra.gmra.mxu0 %v2590_v59  ;;  %620 = vst [vmem:[#allocation11 + $0x10] sm:$0xff] %v2590_v59 }
 0x58c   :  { %793 = vmatpush1.msra.mxu0 %v2208_v2  ;;  %856 = vmatprep.mubr.f32.mxu0 %v2996_v58 }
 0x58d   :  { %794 = vmatprep.subr.mxu0 %v2210_v3 }
 0x58e   :  { %795 = vmatpush1.msra.mxu0 %v2213_v4 }
 0x58f   :  { %796 = vmatprep.subr.mxu0 %v2216_v5 }
 0x590   :  { %797 = vmatpush1.msra.mxu0 %v2219_v6 }
 0x591   :  { %798 = vmatprep.subr.mxu0 %v2222_v7 }
 0x592   :  { %799 = vmatpush1.msra.mxu0 %v2225_v8 }
 0x593   :  { %800 = vmatprep.subr.mxu0 %v2228_v9 }
 0x594   :  { %801 = vmatpush1.msra.mxu0 %v2231_v10 }
 0x595   :  { %802 = vmatprep.subr.mxu0 %v2234_v11 }
 0x596   :  { %803 = vmatpush1.msra.mxu0 %v2237_v12 }
 0x597   :  { %804 = vmatprep.subr.mxu0 %v2240_v13 }
 0x598   :  { %805 = vmatpush1.msra.mxu0 %v2243_v14 }
 0x599   :  { %806 = vmatprep.subr.mxu0 %v2246_v15 }
 0x59a   :  { %807 = vmatpush1.msra.mxu0 %v2249_v16 }
 0x59b   :  { %808 = vmatprep.subr.mxu0 %v2252_v17 }
 0x59c   :  { %809 = vmatpush1.msra.mxu0 %v2255_v18 }
 0x59d   :  { %810 = vmatprep.subr.mxu0 %v2258_v19 }
 0x59e   :  { %811 = vmatpush1.msra.mxu0 %v2261_v20 }
 0x59f   :  { %812 = vmatprep.subr.mxu0 %v2264_v21 }
 0x5a0   :  { %813 = vmatpush1.msra.mxu0 %v2267_v22 }
 0x5a1   :  { %814 = vmatprep.subr.mxu0 %v2270_v23 }
 0x5a2   :  { %815 = vmatpush1.msra.mxu0 %v2273_v24 }
 0x5a3   :  { %816 = vmatprep.subr.mxu0 %v2276_v25 }
 0x5a4   :  { %817 = vmatpush1.msra.mxu0 %v2279_v26 }
 0x5a5   :  { %818 = vmatprep.subr.mxu0 %v2282_v27 }
 0x5a6   :  { %819 = vmatpush1.msra.mxu0 %v2285_v28 }
 0x5a7   :  { %820 = vmatprep.subr.mxu0 %v2288_v29 }
 0x5a8   :  { %821 = vmatpush1.msra.mxu0 %v2291_v30 }
 0x5a9   :  { %822 = vmatprep.subr.mxu0 %v2294_v31 }
 0x5aa   :  { %823 = vmatpush1.msra.mxu0 %v2297_v32 }
 0x5ab   :  { %958 = vmatprep.subr.mxu0 %v2206_v1  ;;  %v2998_v1 = vld [vmem:[#allocation16_spill] sm:$0xff] }
 0x64b   :  { %v692_v60 = vpop.f32.mrf.mxu0 }
 0x64c   :  { %v693_v61 = vadd.f32 %v692_v60, %v623_v49 }
 0x64d   :  { %v694_v53 = vpop.f32.mrf.mxu0 }
 0x64e   :  { %v1476_v62 = vmul.f32 -1.442695, %v693_v61  ;;  %v695_v54 = vadd.f32 %v694_v53, %v624_v52  ;;  %v2817_v52 = vld [vmem:[#allocation8 + $0x30] sm:$0xff]  ;;  %v2820_v53 = vld [vmem:[#allocation8 + $0x28] sm:$0xff] }
 0x650   :  { %1945 = vpow2.f32 %v1476_v62  ;;  %v1477_v55 = vmul.f32 -1.442695, %v695_v54  ;;  %v2823_v54 = vld [vmem:[#allocation8 + $0x20] sm:$0xff] }
 0x65d   :  { %v1946_v63 = vpop.eup %1945 }
 0x65e   :  { %v703_v50 = vadd.f32 1.0, %v1946_v63 }
 0x660   :  { %1947 = vrcp.f32 %v703_v50 }
 0x661   :  { %1949 = vpow2.f32 %v1477_v55  ;;  %v2826_v55 = vld [vmem:[#allocation8 + $0x18] sm:$0xff] }
 0x66d   :  { %v1948_v51 = vpop.eup %1947 }
 0x66e   :  { %v709_v0 = vmul.f32 %v1948_v51, %v2590_v59  ;;  %v1950_v56 = vpop.eup %1949 }
 0x66f   :  { %v704_v49 = vadd.f32 1.0, %v1950_v56  ;;  %v2829_v56 = vld [vmem:[#allocation8 + $0x10] sm:$0xff] }
 0x670   :  { %1760 = vmatmul.mubr.f32.vlgmr.msra.gmra.mxu1 %v709_v0 }
 0x671   :  { %1763 = vmatpush3.msra.mxu1 %v2339_v34  ;;  %1794 = vmatprep.mubr.msk.f32.mxu1 %vm2162_vm0, %v2996_v58 }
 0x672   :  { %1764 = vmatprep.subr.mxu1 %v2996_v58 }
 0x673   :  { %1765 = vmatpush3.msra.mxu1 %v2343_v35 }
 0x674   :  { %1766 = vmatprep.subr.mxu1 %v2996_v58 }
 0x675   :  { %1767 = vmatpush3.msra.mxu1 %v2347_v36 }
 0x676   :  { %1768 = vmatprep.subr.mxu1 %v2996_v58 }
 0x677   :  { %1769 = vmatpush3.msra.mxu1 %v2351_v37 }
 0x678   :  { %1770 = vmatprep.subr.mxu1 %v2996_v58 }
 0x679   :  { %1771 = vmatpush3.msra.mxu1 %v2355_v38 }
 0x67a   :  { %1772 = vmatprep.subr.mxu1 %v2996_v58 }
 0x67b   :  { %1773 = vmatpush3.msra.mxu1 %v2359_v39 }
 0x67c   :  { %1774 = vmatprep.subr.mxu1 %v2996_v58 }
 0x67d   :  { %1775 = vmatpush3.msra.mxu1 %v2363_v40 }
 0x67e   :  { %1776 = vmatprep.subr.mxu1 %v2996_v58 }
 0x67f   :  { %1777 = vmatpush3.msra.mxu1 %v2367_v41 }
 0x680   :  { %1778 = vmatprep.subr.mxu1 %v2996_v58 }
 0x681   :  { %1779 = vmatpush3.msra.mxu1 %v2371_v42 }
 0x682   :  { %1780 = vmatprep.subr.mxu1 %v2996_v58 }
 0x683   :  { %1781 = vmatpush3.msra.mxu1 %v2375_v43 }
 0x684   :  { %1782 = vmatprep.subr.mxu1 %v2996_v58 }
 0x685   :  { %1783 = vmatpush3.msra.mxu1 %v2377_v44 }
 0x686   :  { %1784 = vmatprep.subr.mxu1 %v2996_v58 }
 0x687   :  { %1785 = vmatpush3.msra.mxu1 %v2383_v45 }
 0x688   :  { %1786 = vmatprep.subr.mxu1 %v2996_v58 }
 0x689   :  { %1787 = vmatpush3.msra.mxu1 %v2387_v46 }
 0x68a   :  { %1788 = vmatprep.subr.mxu1 %v2996_v58 }
 0x68b   :  { %1789 = vmatpush3.msra.mxu1 %v2391_v47 }
 0x68c   :  { %1790 = vmatprep.subr.mxu1 %v2996_v58 }
 0x68d   :  { %1791 = vmatpush3.msra.mxu1 %v2395_v48 }
 0x68e   :  { %1792 = vmatprep.subr.mxu1 %v2996_v58 }
 0x68f   :  { %1793 = vmatpush3.msra.mxu1 %v2998_v1 }
 0x690   :  { %1797 = vmatprep.subr.mxu1 %v2996_v58 }
 0x730   :  { %v776_v33 = vpop.f32.mrf.mxu1 }
 0x731   :  { %v777_v60 = vadd.f32 %v776_v33, %v625_v57  ;;  %v2832_v57 = vld [vmem:[#allocation8 + $0x8] sm:$0xff]  ;;  %v2835_v33 = vld [vmem:[#allocation8] sm:$0xff] }
 0x732   :  { %v1761_v61 = vpop.f32.mrf.mxu1 }
 0x733   :  { %1951 = vtanh.f32 %v777_v60 }
 0x734   :  { %1953 = vrcp.f32 %v704_v49  ;;  %v955_v49 = vld [vmem:[#allocation3 + $0x78] sm:$0xff] }
 0x740   :  { %v1952_v62 = vpop.eup %1951 }
 0x741   :  { %v781_v63 = vsub.f32 %v1952_v62, %v2590_v59  ;;  %v1954_v50 = vpop.eup %1953 }
 0x743   :  { %v782_v51 = vmul.f32 %v1954_v50, %v781_v63 }
 0x745   :  { %v2664_v0 = vadd.f32 %v782_v51, %v2590_v59  ;;  %v2811_v59 = vld [vmem:[#allocation8 + $0x40] sm:$0xff] }
 0x747   :  { %857 = vmatmul.mubr.f32.vlgmr.msra.gmra.mxu0 %v2664_v0  ;;  %786 = vst [vmem:[#allocation11 + $0x18] sm:$0xff] %v2664_v0 }
 0x748   :  { %959 = vmatpush1.msra.mxu0 %v2208_v2  ;;  %1022 = vmatprep.mubr.f32.mxu0 %v2996_v58  ;;  %v2700_v2 = vld [vmem:[#allocation8 + $0xf8] sm:$0xff] }
 0x749   :  { %960 = vmatprep.subr.mxu0 %v2210_v3  ;;  %v789_v3 = vld [vmem:[#allocation3 + $0x60] sm:$0xff] }
 0x74a   :  { %961 = vmatpush1.msra.mxu0 %v2213_v4 }
 0x74b   :  { %962 = vmatprep.subr.mxu0 %v2216_v5 }
 0x74c   :  { %963 = vmatpush1.msra.mxu0 %v2219_v6 }
 0x74d   :  { %964 = vmatprep.subr.mxu0 %v2222_v7 }
 0x74e   :  { %965 = vmatpush1.msra.mxu0 %v2225_v8 }
 0x74f   :  { %966 = vmatprep.subr.mxu0 %v2228_v9 }
 0x750   :  { %967 = vmatpush1.msra.mxu0 %v2231_v10 }
 0x751   :  { %968 = vmatprep.subr.mxu0 %v2234_v11  ;;  %v790_v11 = vld [vmem:[#allocation3 + $0x68] sm:$0xff] }
 0x752   :  { %969 = vmatpush1.msra.mxu0 %v2237_v12 }
 0x753   :  { %970 = vmatprep.subr.mxu0 %v2240_v13 }
 0x754   :  { %971 = vmatpush1.msra.mxu0 %v2243_v14 }
 0x755   :  { %972 = vmatprep.subr.mxu0 %v2246_v15 }
 0x756   :  { %973 = vmatpush1.msra.mxu0 %v2249_v16  ;;  %v791_v16 = vld [vmem:[#allocation3 + $0x70] sm:$0xff] }
 0x757   :  { %974 = vmatprep.subr.mxu0 %v2252_v17 }
 0x758   :  { %975 = vmatpush1.msra.mxu0 %v2255_v18 }
 0x759   :  { %976 = vmatprep.subr.mxu0 %v2258_v19 }
 0x75a   :  { %977 = vmatpush1.msra.mxu0 %v2261_v20 }
 0x75b   :  { %978 = vmatprep.subr.mxu0 %v2264_v21 }
 0x75c   :  { %979 = vmatpush1.msra.mxu0 %v2267_v22 }
 0x75d   :  { %980 = vmatprep.subr.mxu0 %v2270_v23 }
 0x75e   :  { %981 = vmatpush1.msra.mxu0 %v2273_v24 }
 0x75f   :  { %982 = vmatprep.subr.mxu0 %v2276_v25 }
 0x760   :  { %983 = vmatpush1.msra.mxu0 %v2279_v26  ;;  %v2744_v26 = vld [vmem:[#allocation8 + $0xf0] sm:$0xff] }
 0x761   :  { %984 = vmatprep.subr.mxu0 %v2282_v27  ;;  %v2748_v27 = vld [vmem:[#allocation8 + $0xe8] sm:$0xff] }
 0x762   :  { %985 = vmatpush1.msra.mxu0 %v2285_v28  ;;  %v2751_v28 = vld [vmem:[#allocation8 + $0xe0] sm:$0xff] }
 0x763   :  { %986 = vmatprep.subr.mxu0 %v2288_v29  ;;  %v2754_v29 = vld [vmem:[#allocation8 + $0xd8] sm:$0xff] }
 0x764   :  { %987 = vmatpush1.msra.mxu0 %v2291_v30  ;;  %v2757_v30 = vld [vmem:[#allocation8 + $0xd0] sm:$0xff] }
 0x765   :  { %988 = vmatprep.subr.mxu0 %v2294_v31  ;;  %v2760_v31 = vld [vmem:[#allocation8 + $0xc8] sm:$0xff] }
 0x766   :  { %989 = vmatpush1.msra.mxu0 %v2297_v32  ;;  %v2763_v32 = vld [vmem:[#allocation8 + $0xc0] sm:$0xff] }
 0x767   :  { %1124 = vmatprep.subr.mxu0 %v2700_v2 }
 0x807   :  { %v858_v4 = vpop.f32.mrf.mxu0 }
 0x808   :  { %v859_v5 = vadd.f32 %v858_v4, %v789_v3  ;;  %v2840_v3 = vld [vmem:[#allocation9 + $0x78] sm:$0xff]  ;;  %v2850_v4 = vld [vmem:[#allocation9 + $0x68] sm:$0xff] }
 0x809   :  { %v860_v12 = vpop.f32.mrf.mxu0 }
 0x80a   :  { %v1478_v6 = vmul.f32 -1.442695, %v859_v5  ;;  %v861_v13 = vadd.f32 %v860_v12, %v790_v11  ;;  %v2854_v5 = vld [vmem:[#allocation9 + $0x60] sm:$0xff]  ;;  %v2878_v11 = vld [vmem:[#allocation9 + $0x30] sm:$0xff]  ;;  %v2882_v12 = vld [vmem:[#allocation9 + $0x28] sm:$0xff] }
 0x80c   :  { %1955 = vpow2.f32 %v1478_v6  ;;  %v1479_v14 = vmul.f32 -1.442695, %v861_v13  ;;  %v2858_v6 = vld [vmem:[#allocation9 + $0x58] sm:$0xff]  ;;  %v2886_v13 = vld [vmem:[#allocation9 + $0x20] sm:$0xff] }
 0x819   :  { %v1956_v7 = vpop.eup %1955 }
 0x81a   :  { %v869_v8 = vadd.f32 1.0, %v1956_v7  ;;  %v2862_v7 = vld [vmem:[#allocation9 + $0x50] sm:$0xff] }
 0x81c   :  { %1957 = vrcp.f32 %v869_v8  ;;  %v2866_v8 = vld [vmem:[#allocation9 + $0x48] sm:$0xff] }
 0x81d   :  { %1959 = vpow2.f32 %v1479_v14  ;;  %v2890_v14 = vld [vmem:[#allocation9 + $0x18] sm:$0xff] }
 0x829   :  { %v1958_v9 = vpop.eup %1957 }
 0x82a   :  { %v875_v10 = vmul.f32 %v1958_v9, %v2664_v0  ;;  %v1960_v15 = vpop.eup %1959  ;;  %v2870_v9 = vld [vmem:[#allocation9 + $0x40] sm:$0xff] }
 0x82b   :  { %v870_v18 = vadd.f32 1.0, %v1960_v15  ;;  %v2894_v15 = vld [vmem:[#allocation9 + $0x10] sm:$0xff] }
 0x82c   :  { %1795 = vmatmul.mubr.f32.vlgmr.msra.gmra.mxu1 %v875_v10  ;;  %v2874_v10 = vld [vmem:[#allocation9 + $0x38] sm:$0xff] }
 0x82d   :  { %1798 = vmatpush3.msra.mxu1 %v2339_v34  ;;  %1829 = vmatprep.mubr.msk.f32.mxu1 %vm2162_vm0, %v2996_v58  ;;  %v2766_v34 = vld [vmem:[#allocation8 + $0xb8] sm:$0xff] }
 0x82e   :  { %1799 = vmatprep.subr.mxu1 %v2996_v58 }
 0x82f   :  { %1800 = vmatpush3.msra.mxu1 %v2343_v35  ;;  %v2769_v35 = vld [vmem:[#allocation8 + $0xb0] sm:$0xff] }
 0x830   :  { %1801 = vmatprep.subr.mxu1 %v2996_v58 }
 0x831   :  { %1802 = vmatpush3.msra.mxu1 %v2347_v36  ;;  %v2772_v36 = vld [vmem:[#allocation8 + $0xa8] sm:$0xff] }
 0x832   :  { %1803 = vmatprep.subr.mxu1 %v2996_v58 }
 0x833   :  { %1804 = vmatpush3.msra.mxu1 %v2351_v37  ;;  %v2775_v37 = vld [vmem:[#allocation8 + $0xa0] sm:$0xff] }
 0x834   :  { %1805 = vmatprep.subr.mxu1 %v2996_v58 }
 0x835   :  { %1806 = vmatpush3.msra.mxu1 %v2355_v38  ;;  %v2778_v38 = vld [vmem:[#allocation8 + $0x98] sm:$0xff] }
 0x836   :  { %1807 = vmatprep.subr.mxu1 %v2996_v58 }
 0x837   :  { %1808 = vmatpush3.msra.mxu1 %v2359_v39  ;;  %v2781_v39 = vld [vmem:[#allocation8 + $0x90] sm:$0xff] }
 0x838   :  { %1809 = vmatprep.subr.mxu1 %v2996_v58 }
 0x839   :  { %1810 = vmatpush3.msra.mxu1 %v2363_v40  ;;  %v2784_v40 = vld [vmem:[#allocation8 + $0x88] sm:$0xff] }
 0x83a   :  { %1811 = vmatprep.subr.mxu1 %v2996_v58 }
 0x83b   :  { %1812 = vmatpush3.msra.mxu1 %v2367_v41  ;;  %v2787_v41 = vld [vmem:[#allocation8 + $0x80] sm:$0xff] }
 0x83c   :  { %1813 = vmatprep.subr.mxu1 %v2996_v58 }
 0x83d   :  { %1814 = vmatpush3.msra.mxu1 %v2371_v42  ;;  %v2790_v42 = vld [vmem:[#allocation8 + $0x78] sm:$0xff] }
 0x83e   :  { %1815 = vmatprep.subr.mxu1 %v2996_v58 }
 0x83f   :  { %1816 = vmatpush3.msra.mxu1 %v2375_v43  ;;  %v2793_v43 = vld [vmem:[#allocation8 + $0x70] sm:$0xff] }
 0x840   :  { %1817 = vmatprep.subr.mxu1 %v2996_v58 }
 0x841   :  { %1818 = vmatpush3.msra.mxu1 %v2377_v44  ;;  %v2796_v44 = vld [vmem:[#allocation8 + $0x68] sm:$0xff] }
 0x842   :  { %1819 = vmatprep.subr.mxu1 %v2996_v58 }
 0x843   :  { %1820 = vmatpush3.msra.mxu1 %v2383_v45  ;;  %v2799_v45 = vld [vmem:[#allocation8 + $0x60] sm:$0xff] }
 0x844   :  { %1821 = vmatprep.subr.mxu1 %v2996_v58 }
 0x845   :  { %1822 = vmatpush3.msra.mxu1 %v2387_v46  ;;  %v2802_v46 = vld [vmem:[#allocation8 + $0x58] sm:$0xff] }
 0x846   :  { %1823 = vmatprep.subr.mxu1 %v2996_v58 }
 0x847   :  { %1824 = vmatpush3.msra.mxu1 %v2391_v47  ;;  %v2805_v47 = vld [vmem:[#allocation8 + $0x50] sm:$0xff] }
 0x848   :  { %1825 = vmatprep.subr.mxu1 %v2996_v58 }
 0x849   :  { %1826 = vmatpush3.msra.mxu1 %v2395_v48  ;;  %v2808_v48 = vld [vmem:[#allocation8 + $0x48] sm:$0xff] }
 0x84a   :  { %1827 = vmatprep.subr.mxu1 %v2996_v58 }
 0x84b   :  { %1828 = vmatpush3.msra.mxu1 %v2998_v1  ;;  %v2814_v1 = vld [vmem:[#allocation8 + $0x38] sm:$0xff] }
 0x84c   :  { %1832 = vmatprep.subr.mxu1 %v2996_v58 }
 0x8ec   :  { %v942_v17 = vpop.f32.mrf.mxu1 }
 0x8ed   :  { %v943_v19 = vadd.f32 %v942_v17, %v791_v16  ;;  %v2898_v16 = vld [vmem:[#allocation9 + $0x8] sm:$0xff]  ;;  %v2902_v17 = vld [vmem:[#allocation9] sm:$0xff] }
 0x8ee   :  { %v1796_v20 = vpop.f32.mrf.mxu1 }
 0x8ef   :  { %1961 = vtanh.f32 %v943_v19 }
 0x8f0   :  { %1963 = vrcp.f32 %v870_v18  ;;  %v956_v18 = vld [vmem:[#allocation3 + $0x80] sm:$0xff] }
 0x8fc   :  { %v1962_v21 = vpop.eup %1961 }
 0x8fd   :  { %v947_v22 = vsub.f32 %v1962_v21, %v2664_v0  ;;  %v1964_v23 = vpop.eup %1963 }
 0x8ff   :  { %v948_v24 = vmul.f32 %v1964_v23, %v947_v22  ;;  %v957_v23 = vld [vmem:[#allocation3 + $0x88] sm:$0xff] }
 0x901   :  { %v2740_v25 = vadd.f32 %v948_v24, %v2664_v0 }
 0x903   :  { %1023 = vmatmul.mubr.f32.vlgmr.msra.gmra.mxu0 %v2740_v25  ;;  %952 = vst [vmem:[#allocation11 + $0x20] sm:$0xff] %v2740_v25 }
 0x904   :  { %1125 = vmatpush1.msra.mxu0 %v2744_v26  ;;  %1188 = vmatprep.mubr.f32.mxu0 %v2996_v58 }
 0x905   :  { %1126 = vmatprep.subr.mxu0 %v2748_v27 }
 0x906   :  { %1127 = vmatpush1.msra.mxu0 %v2751_v28 }
 0x907   :  { %1128 = vmatprep.subr.mxu0 %v2754_v29 }
 0x908   :  { %1129 = vmatpush1.msra.mxu0 %v2757_v30 }
 0x909   :  { %1130 = vmatprep.subr.mxu0 %v2760_v31 }
 0x90a   :  { %1131 = vmatpush1.msra.mxu0 %v2763_v32 }
 0x90b   :  { %1132 = vmatprep.subr.mxu0 %v2766_v34 }
 0x90c   :  { %1133 = vmatpush1.msra.mxu0 %v2769_v35 }
 0x90d   :  { %1134 = vmatprep.subr.mxu0 %v2772_v36 }
 0x90e   :  { %1135 = vmatpush1.msra.mxu0 %v2775_v37 }
 0x90f   :  { %1136 = vmatprep.subr.mxu0 %v2778_v38 }
 0x910   :  { %1137 = vmatpush1.msra.mxu0 %v2781_v39 }
 0x911   :  { %1138 = vmatprep.subr.mxu0 %v2784_v40 }
 0x912   :  { %1139 = vmatpush1.msra.mxu0 %v2787_v41 }
 0x913   :  { %1140 = vmatprep.subr.mxu0 %v2790_v42 }
 0x914   :  { %1141 = vmatpush1.msra.mxu0 %v2793_v43 }
 0x915   :  { %1142 = vmatprep.subr.mxu0 %v2796_v44 }
 0x916   :  { %1143 = vmatpush1.msra.mxu0 %v2799_v45 }
 0x917   :  { %1144 = vmatprep.subr.mxu0 %v2802_v46 }
 0x918   :  { %1145 = vmatpush1.msra.mxu0 %v2805_v47 }
 0x919   :  { %1146 = vmatprep.subr.mxu0 %v2808_v48 }
 0x91a   :  { %1147 = vmatpush1.msra.mxu0 %v2811_v59 }
 0x91b   :  { %1148 = vmatprep.subr.mxu0 %v2814_v1 }
 0x91c   :  { %1149 = vmatpush1.msra.mxu0 %v2817_v52 }
 0x91d   :  { %1150 = vmatprep.subr.mxu0 %v2820_v53 }
 0x91e   :  { %1151 = vmatpush1.msra.mxu0 %v2823_v54 }
 0x91f   :  { %1152 = vmatprep.subr.mxu0 %v2826_v55 }
 0x920   :  { %1153 = vmatpush1.msra.mxu0 %v2829_v56 }
 0x921   :  { %1154 = vmatprep.subr.mxu0 %v2832_v57 }
 0x922   :  { %1155 = vmatpush1.msra.mxu0 %v2835_v33 }
 0x923   :  { %1290 = vmatprep.subr.mxu0 %v2700_v2  ;;  %v2846_v2 = vld [vmem:[#allocation9 + $0x70] sm:$0xff] }
 0x9c3   :  { %v1024_v60 = vpop.f32.mrf.mxu0 }
 0x9c4   :  { %v1025_v61 = vadd.f32 %v1024_v60, %v955_v49 }
 0x9c5   :  { %v1026_v19 = vpop.f32.mrf.mxu0 }
 0x9c6   :  { %v1480_v62 = vmul.f32 -1.442695, %v1025_v61  ;;  %v1027_v20 = vadd.f32 %v1026_v19, %v956_v18 }
 0x9c8   :  { %1965 = vpow2.f32 %v1480_v62  ;;  %v1481_v21 = vmul.f32 -1.442695, %v1027_v20 }
 0x9d5   :  { %v1966_v63 = vpop.eup %1965 }
 0x9d6   :  { %v1035_v50 = vadd.f32 1.0, %v1966_v63 }
 0x9d8   :  { %1967 = vrcp.f32 %v1035_v50 }
 0x9d9   :  { %1969 = vpow2.f32 %v1481_v21 }
 0x9e5   :  { %v1968_v51 = vpop.eup %1967 }
 0x9e6   :  { %v1041_v0 = vmul.f32 %v1968_v51, %v2740_v25  ;;  %v1970_v22 = vpop.eup %1969 }
 0x9e7   :  { %v1036_v49 = vadd.f32 1.0, %v1970_v22 }
 0x9e8   :  { %1830 = vmatmul.mubr.f32.vlgmr.msra.gmra.mxu1 %v1041_v0 }
 0x9e9   :  { %1833 = vmatpush3.msra.mxu1 %v2840_v3  ;;  %1864 = vmatprep.mubr.msk.f32.mxu1 %vm2162_vm0, %v2996_v58 }
 0x9ea   :  { %1834 = vmatprep.subr.mxu1 %v2996_v58 }
 0x9eb   :  { %1835 = vmatpush3.msra.mxu1 %v2846_v2 }
 0x9ec   :  { %1836 = vmatprep.subr.mxu1 %v2996_v58 }
 0x9ed   :  { %1837 = vmatpush3.msra.mxu1 %v2850_v4 }
 0x9ee   :  { %1838 = vmatprep.subr.mxu1 %v2996_v58 }
 0x9ef   :  { %1839 = vmatpush3.msra.mxu1 %v2854_v5 }
 0x9f0   :  { %1840 = vmatprep.subr.mxu1 %v2996_v58 }
 0x9f1   :  { %1841 = vmatpush3.msra.mxu1 %v2858_v6 }
 0x9f2   :  { %1842 = vmatprep.subr.mxu1 %v2996_v58 }
 0x9f3   :  { %1843 = vmatpush3.msra.mxu1 %v2862_v7 }
 0x9f4   :  { %1844 = vmatprep.subr.mxu1 %v2996_v58 }
 0x9f5   :  { %1845 = vmatpush3.msra.mxu1 %v2866_v8 }
 0x9f6   :  { %1846 = vmatprep.subr.mxu1 %v2996_v58 }
 0x9f7   :  { %1847 = vmatpush3.msra.mxu1 %v2870_v9 }
 0x9f8   :  { %1848 = vmatprep.subr.mxu1 %v2996_v58 }
 0x9f9   :  { %1849 = vmatpush3.msra.mxu1 %v2874_v10 }
 0x9fa   :  { %1850 = vmatprep.subr.mxu1 %v2996_v58 }
 0x9fb   :  { %1851 = vmatpush3.msra.mxu1 %v2878_v11 }
 0x9fc   :  { %1852 = vmatprep.subr.mxu1 %v2996_v58 }
 0x9fd   :  { %1853 = vmatpush3.msra.mxu1 %v2882_v12 }
 0x9fe   :  { %1854 = vmatprep.subr.mxu1 %v2996_v58 }
 0x9ff   :  { %1855 = vmatpush3.msra.mxu1 %v2886_v13 }
 0xa00   :  { %1856 = vmatprep.subr.mxu1 %v2996_v58 }
 0xa01   :  { %1857 = vmatpush3.msra.mxu1 %v2890_v14 }
 0xa02   :  { %1858 = vmatprep.subr.mxu1 %v2996_v58 }
 0xa03   :  { %1859 = vmatpush3.msra.mxu1 %v2894_v15 }
 0xa04   :  { %1860 = vmatprep.subr.mxu1 %v2996_v58 }
 0xa05   :  { %1861 = vmatpush3.msra.mxu1 %v2898_v16 }
 0xa06   :  { %1862 = vmatprep.subr.mxu1 %v2996_v58 }
 0xa07   :  { %1863 = vmatpush3.msra.mxu1 %v2902_v17 }
 0xa08   :  { %1867 = vmatprep.subr.mxu1 %v2996_v58 }
 0xaa8   :  { %v1108_v24 = vpop.f32.mrf.mxu1 }
 0xaa9   :  { %v1109_v60 = vadd.f32 %v1108_v24, %v957_v23 }
 0xaaa   :  { %v1831_v61 = vpop.f32.mrf.mxu1 }
 0xaab   :  { %1971 = vtanh.f32 %v1109_v60 }
 0xaac   :  { %1973 = vrcp.f32 %v1036_v49 }
 0xab8   :  { %v1972_v62 = vpop.eup %1971 }
 0xab9   :  { %v1113_v63 = vsub.f32 %v1972_v62, %v2740_v25  ;;  %v1974_v50 = vpop.eup %1973 }
 0xabb   :  { %v1114_v51 = vmul.f32 %v1974_v50, %v1113_v63 }
 0xabd   :  { %v2908_v0 = vadd.f32 %v1114_v51, %v2740_v25  ;;  %v1121_v25 = vld [vmem:[#allocation3 + $0x90] sm:$0xff] }
 0xabf   :  { %1189 = vmatmul.mubr.f32.vlgmr.msra.gmra.mxu0 %v2908_v0  ;;  %1118 = vst [vmem:[#allocation11 + $0x28] sm:$0xff] %v2908_v0 }
 0xac0   :  { %1291 = vmatpush1.msra.mxu0 %v2744_v26  ;;  %1354 = vmatprep.mubr.f32.mxu0 %v2996_v58 }
 0xac1   :  { %1292 = vmatprep.subr.mxu0 %v2748_v27 }
 0xac2   :  { %1293 = vmatpush1.msra.mxu0 %v2751_v28 }
 0xac3   :  { %1294 = vmatprep.subr.mxu0 %v2754_v29 }
 0xac4   :  { %1295 = vmatpush1.msra.mxu0 %v2757_v30 }
 0xac5   :  { %1296 = vmatprep.subr.mxu0 %v2760_v31 }
 0xac6   :  { %1297 = vmatpush1.msra.mxu0 %v2763_v32 }
 0xac7   :  { %1298 = vmatprep.subr.mxu0 %v2766_v34  ;;  %v1122_v34 = vld [vmem:[#allocation3 + $0x98] sm:$0xff] }
 0xac8   :  { %1299 = vmatpush1.msra.mxu0 %v2769_v35 }
 0xac9   :  { %1300 = vmatprep.subr.mxu0 %v2772_v36 }
 0xaca   :  { %1301 = vmatpush1.msra.mxu0 %v2775_v37 }
 0xacb   :  { %1302 = vmatprep.subr.mxu0 %v2778_v38 }
 0xacc   :  { %1303 = vmatpush1.msra.mxu0 %v2781_v39  ;;  %v1123_v39 = vld [vmem:[#allocation3 + $0xa0] sm:$0xff] }
 0xacd   :  { %1304 = vmatprep.subr.mxu0 %v2784_v40 }
 0xace   :  { %1305 = vmatpush1.msra.mxu0 %v2787_v41 }
 0xacf   :  { %1306 = vmatprep.subr.mxu0 %v2790_v42 }
 0xad0   :  { %1307 = vmatpush1.msra.mxu0 %v2793_v43 }
 0xad1   :  { %1308 = vmatprep.subr.mxu0 %v2796_v44 }
 0xad2   :  { %1309 = vmatpush1.msra.mxu0 %v2799_v45 }
 0xad3   :  { %1310 = vmatprep.subr.mxu0 %v2802_v46 }
 0xad4   :  { %1311 = vmatpush1.msra.mxu0 %v2805_v47 }
 0xad5   :  { %1312 = vmatprep.subr.mxu0 %v2808_v48  ;;  %v1287_v48 = vld [vmem:[#allocation3 + $0xa8] sm:$0xff] }
 0xad6   :  { %1313 = vmatpush1.msra.mxu0 %v2811_v59 }
 0xad7   :  { %1314 = vmatprep.subr.mxu0 %v2814_v1 }
 0xad8   :  { %1315 = vmatpush1.msra.mxu0 %v2817_v52 }
 0xad9   :  { %1316 = vmatprep.subr.mxu0 %v2820_v53 }
 0xada   :  { %1317 = vmatpush1.msra.mxu0 %v2823_v54 }
 0xadb   :  { %1318 = vmatprep.subr.mxu0 %v2826_v55 }
 0xadc   :  { %1319 = vmatpush1.msra.mxu0 %v2829_v56 }
 0xadd   :  { %1320 = vmatprep.subr.mxu0 %v2832_v57  ;;  %v1288_v57 = vld [vmem:[#allocation3 + $0xb0] sm:$0xff] }
 0xade   :  { %1321 = vmatpush1.msra.mxu0 %v2835_v33 }
 0xb7f   :  { %v1190_v26 = vpop.f32.mrf.mxu0 }
 0xb80   :  { %v1191_v27 = vadd.f32 %v1190_v26, %v1121_v25 }
 0xb81   :  { %v1192_v35 = vpop.f32.mrf.mxu0 }
 0xb82   :  { %v1482_v28 = vmul.f32 -1.442695, %v1191_v27  ;;  %v1193_v36 = vadd.f32 %v1192_v35, %v1122_v34 }
 0xb84   :  { %1975 = vpow2.f32 %v1482_v28  ;;  %v1483_v37 = vmul.f32 -1.442695, %v1193_v36 }
 0xb91   :  { %v1976_v29 = vpop.eup %1975 }
 0xb92   :  { %v1201_v30 = vadd.f32 1.0, %v1976_v29 }
 0xb94   :  { %1977 = vrcp.f32 %v1201_v30 }
 0xb95   :  { %1979 = vpow2.f32 %v1483_v37 }
 0xba1   :  { %v1978_v31 = vpop.eup %1977 }
 0xba2   :  { %v1207_v32 = vmul.f32 %v1978_v31, %v2908_v0  ;;  %v1980_v38 = vpop.eup %1979 }
 0xba3   :  { %v1202_v41 = vadd.f32 1.0, %v1980_v38 }
 0xba4   :  { %1865 = vmatmul.mubr.f32.vlgmr.msra.gmra.mxu1 %v1207_v32 }
 0xba5   :  { %1868 = vmatpush3.msra.mxu1 %v2840_v3  ;;  %1899 = vmatprep.mubr.msk.f32.mxu1 %vm2162_vm0, %v2996_v58 }
 0xba6   :  { %1869 = vmatprep.subr.mxu1 %v2996_v58 }
 0xba7   :  { %1870 = vmatpush3.msra.mxu1 %v2846_v2 }
 0xba8   :  { %1871 = vmatprep.subr.mxu1 %v2996_v58 }
 0xba9   :  { %1872 = vmatpush3.msra.mxu1 %v2850_v4 }
 0xbaa   :  { %1873 = vmatprep.subr.mxu1 %v2996_v58 }
 0xbab   :  { %1874 = vmatpush3.msra.mxu1 %v2854_v5  ;;  %v1289_v5 = vld [vmem:[#allocation3 + $0xb8] sm:$0xff] }
 0xbac   :  { %1875 = vmatprep.subr.mxu1 %v2996_v58 }
 0xbad   :  { %1876 = vmatpush3.msra.mxu1 %v2858_v6 }
 0xbae   :  { %1877 = vmatprep.subr.mxu1 %v2996_v58 }
 0xbaf   :  { %1878 = vmatpush3.msra.mxu1 %v2862_v7 }
 0xbb0   :  { %1879 = vmatprep.subr.mxu1 %v2996_v58 }
 0xbb1   :  { %1880 = vmatpush3.msra.mxu1 %v2866_v8 }
 0xbb2   :  { %1881 = vmatprep.subr.mxu1 %v2996_v58 }
 0xbb3   :  { %1882 = vmatpush3.msra.mxu1 %v2870_v9 }
 0xbb4   :  { %1883 = vmatprep.subr.mxu1 %v2996_v58 }
 0xbb5   :  { %1884 = vmatpush3.msra.mxu1 %v2874_v10 }
 0xbb6   :  { %1885 = vmatprep.subr.mxu1 %v2996_v58 }
 0xbb7   :  { %1886 = vmatpush3.msra.mxu1 %v2878_v11 }
 0xbb8   :  { %1887 = vmatprep.subr.mxu1 %v2996_v58 }
 0xbb9   :  { %1888 = vmatpush3.msra.mxu1 %v2882_v12 }
 0xbba   :  { %1889 = vmatprep.subr.mxu1 %v2996_v58 }
 0xbbb   :  { %1890 = vmatpush3.msra.mxu1 %v2886_v13 }
 0xbbc   :  { %1891 = vmatprep.subr.mxu1 %v2996_v58 }
 0xbbd   :  { %1892 = vmatpush3.msra.mxu1 %v2890_v14 }
 0xbbe   :  { %1893 = vmatprep.subr.mxu1 %v2996_v58 }
 0xbbf   :  { %1894 = vmatpush3.msra.mxu1 %v2894_v15 }
 0xbc0   :  { %1895 = vmatprep.subr.mxu1 %v2996_v58 }
 0xbc1   :  { %1896 = vmatpush3.msra.mxu1 %v2898_v16 }
 0xbc2   :  { %1897 = vmatprep.subr.mxu1 %v2996_v58 }
 0xbc3   :  { %1898 = vmatpush3.msra.mxu1 %v2902_v17 }
 0xc64   :  { %v1274_v40 = vpop.f32.mrf.mxu1 }
 0xc65   :  { %v1275_v42 = vadd.f32 %v1274_v40, %v1123_v39 }
 0xc66   :  { %v1866_v43 = vpop.f32.mrf.mxu1 }
 0xc67   :  { %1981 = vtanh.f32 %v1275_v42 }
 0xc68   :  { %1983 = vrcp.f32 %v1202_v41 }
 0xc74   :  { %v1982_v44 = vpop.eup %1981 }
 0xc75   :  { %v1279_v45 = vsub.f32 %v1982_v44, %v2908_v0  ;;  %v1984_v46 = vpop.eup %1983 }
 0xc77   :  { %v1280_v58 = vmul.f32 %v1984_v46, %v1279_v45 }
 0xc79   :  { %v1281_v47 = vadd.f32 %v1280_v58, %v2908_v0 }
 0xc7b   :  { %1355 = vmatmul.mubr.f32.vlgmr.msra.gmra.mxu0 %v1281_v47  ;;  %1284 = vst [vmem:[#allocation11 + $0x30] sm:$0xff] %v1281_v47 }
 0xd3b   :  { %v1356_v59 = vpop.f32.mrf.mxu0 }
 0xd3c   :  { %v1357_v1 = vadd.f32 %v1356_v59, %v1287_v48 }
 0xd3d   :  { %v1358_v33 = vpop.f32.mrf.mxu0 }
 0xd3e   :  { %v1484_v52 = vmul.f32 -1.442695, %v1357_v1  ;;  %v1359_v3 = vadd.f32 %v1358_v33, %v1288_v57 }
 0xd40   :  { %1985 = vpow2.f32 %v1484_v52  ;;  %v1485_v2 = vmul.f32 -1.442695, %v1359_v3 }
 0xd4d   :  { %v1986_v53 = vpop.eup %1985 }
 0xd4e   :  { %v1367_v54 = vadd.f32 1.0, %v1986_v53 }
 0xd50   :  { %1987 = vrcp.f32 %v1367_v54 }
 0xd51   :  { %1989 = vpow2.f32 %v1485_v2 }
 0xd5d   :  { %v1988_v55 = vpop.eup %1987 }
 0xd5e   :  { %v1373_v56 = vmul.f32 %v1988_v55, %v1281_v47  ;;  %v1990_v4 = vpop.eup %1989 }
 0xd5f   :  { %v1368_v7 = vadd.f32 1.0, %v1990_v4 }
 0xd60   :  { %1900 = vmatmul.mubr.f32.vlgmr.msra.gmra.mxu1 %v1373_v56 }
 0xe20   :  { %v1440_v6 = vpop.f32.mrf.mxu1 }
 0xe21   :  { %v1441_v8 = vadd.f32 %v1440_v6, %v1289_v5 }
 0xe22   :  { %v1901_v9 = vpop.f32.mrf.mxu1 }
 0xe23   :  { %1991 = vtanh.f32 %v1441_v8 }
 0xe24   :  { %1993 = vrcp.f32 %v1368_v7 }
 0xe30   :  { %v1992_v10 = vpop.eup %1991 }
 0xe31   :  { %v1445_v11 = vsub.f32 %v1992_v10, %v1281_v47  ;;  %v1994_v12 = vpop.eup %1993 }
 0xe33   :  { %v1446_v13 = vmul.f32 %v1994_v12, %v1445_v11 }
 0xe35   :  { %v1447_v14 = vadd.f32 %v1446_v13, %v1281_v47 }
 0xe37   :  { %1450 = vst [vmem:[#allocation11 + $0x38] sm:$0xff] %v1447_v14 }
 0xe38   :  { %2134 = shalt.err (!%p2131_p10)
}
 0xe39   :  { %1462 = dma.vmem_to_hbm [thread:$0]  %s1457_s3, 1024, %s2990_s4, [#allocation5], %s2159_s9, %s2159_s9, %s2160_s10  }
 0xe3a   :  { %2149 = dma.done.wait [#allocation5], 1024  }
 0xe3b   :  { %2150 = vsyncadd [#allocation5], 4294966272 }
 0xe3c   :  { %1466 = vsyncpa [#allocation4], 1 }
 0xe3d   :  { %1467 = vsyncpa [#allocation7], 1 }
 0xe3e   :  { %1468 = vsyncpa [#allocation10], 1 }
 0xe3f   :  { %1469 = vsyncpa [#allocation5], 1 }

</bundles_post_ra>
